<compile_context>
chip_gen: v7x
topology: tpu7x:2x2x1
jax: 0.10.0
libtpu: 0.0.40
codegen_flags: <defaults>
</compile_context>

<pallas_src>
import jax
import jax.numpy as jnp
from jax.experimental import pallas as pl
from jax.experimental.pallas import tpu as pltpu

# Model hyper-parameters implied by the PyTorch module
INPUT_SIZE = 3        # columnCount = ['ask_price', 'bid_price', 'mark_price']
HIDDEN = 128          # hidden_layer_size
OUTPUT = 1            # output_size


def _lstm_kernel(gx_ref, whh_ref, h_out_ref):
    """Full LSTM recurrence; emits the final hidden state h_T (lane-dense).

    gx_ref  : (T, B, 4H) f32  precomputed x_t @ W_ih^T + (b_ih + b_hh),
              gate order [i, f, o, g], i/f/o columns pre-scaled by 0.5
              (so sigmoid(z) = 0.5 * tanh(scaled_z) + 0.5).
    whh_ref : (H, 4H)    bf16 recurrent weights (transposed), same
              permutation + 0.5 pre-scale on the i/f/o columns.
    h_out_ref: (B, H)    f32  final hidden state.
    """
    H = HIDDEN
    T, B, _ = gx_ref.shape

    # Hoist the 128 KB recurrent-weight load out of the unrolled recurrence.
    whh = whh_ref[...]

    h0 = jnp.zeros((B, H), jnp.float32)
    c0 = jnp.zeros((B, H), jnp.float32)

    def step(t, carry):
        h, c = carry
        # Recurrent matmul: bf16 operands, f32 accumulation on the MXU.
        gates = gx_ref[t] + jnp.dot(h.astype(jnp.bfloat16), whh,
                                    preferred_element_type=jnp.float32)
        # Single EUP pass over all 4H columns: the pre-scaled i/f/o slab
        # yields sigmoids via 0.5*t + 0.5, the last slab is g = tanh directly.
        t_all = jnp.tanh(gates)
        sig = 0.5 * t_all[:, :3 * H] + 0.5
        i_g = sig[:, 0 * H:1 * H]
        f_g = sig[:, 1 * H:2 * H]
        o_g = sig[:, 2 * H:3 * H]
        g_g = t_all[:, 3 * H:4 * H]
        c_new = f_g * c + i_g * g_g
        h_new = o_g * jnp.tanh(c_new)
        return (h_new, c_new)

    # Short fixed trip count: fully unroll so the LLO scheduler sees it.
    h_last, _ = jax.lax.fori_loop(0, T, step, (h0, c0), unroll=True)

    h_out_ref[...] = h_last


def lstm_forward(x, w_ih, w_hh, b_ih, b_hh, w_lin, b_lin):
    """x: (T, B, INPUT_SIZE) float32.  Returns (B, OUTPUT) predictions."""
    T, B, F = x.shape
    assert F == INPUT_SIZE
    H = HIDDEN

    # Gate permutation [i, f, g, o] -> [i, f, o, g] so all sigmoid gates form
    # one contiguous slab, plus the 0.5 pre-scale for the tanh-form sigmoid.
    # Applied consistently to w_ih rows, w_hh rows and the folded bias.
    perm = jnp.concatenate([jnp.arange(0 * H, 1 * H),    # i
                            jnp.arange(1 * H, 2 * H),    # f
                            jnp.arange(3 * H, 4 * H),    # o
                            jnp.arange(2 * H, 3 * H)])   # g
    scale = jnp.concatenate([jnp.full((3 * H,), 0.5, jnp.float32),
                             jnp.ones((H,), jnp.float32)])

    w_ih_p = w_ih[perm] * scale[:, None]                  # (4H, F)
    w_hh_p = w_hh[perm] * scale[:, None]                  # (4H, H)
    bias_p = (b_ih + b_hh)[perm] * scale                  # (4H,)

    # Hoisted input projection + folded bias (single XLA matmul).
    # NOTE: (T, B, 4H) f32 is VMEM-resident in the kernel. Fine at small T;
    # for long sequences store gates_x in bf16 or chunk T (v5e's 16 MiB
    # scoped-VMEM default binds first, then v7x's 64 MiB physical VMEM).
    gates_x = (jnp.einsum('tbf,gf->tbg', x, w_ih_p,
                          preferred_element_type=jnp.float32)
               + bias_p).astype(jnp.float32)              # (T, B, 4H)

    whh_t = w_hh_p.T.astype(jnp.bfloat16)                 # (H, 4H) bf16

    cost = pl.CostEstimate(
        flops=2 * T * B * H * 4 * H + 10 * T * B * H,
        transcendentals=5 * T * B * H,
        bytes_accessed=T * B * 4 * H * 4 + H * 4 * H * 2 + B * H * 4,
    )

    # No grid: a single invocation with whole arrays resident in VMEM, so the
    # gates_x block is not redundantly double-buffered by the pipeline.
    h_last = pl.pallas_call(
        _lstm_kernel,
        out_shape=jax.ShapeDtypeStruct((B, H), jnp.float32),
        in_specs=[
            pl.BlockSpec(memory_space=pltpu.MemorySpace.VMEM),   # gates_x
            pl.BlockSpec(memory_space=pltpu.MemorySpace.VMEM),   # W_hh^T
        ],
        out_specs=pl.BlockSpec(memory_space=pltpu.MemorySpace.VMEM),
        cost_estimate=cost,
    )(gates_x, whh_t)

    # Linear(128 -> 1) head on lstm_out[-1], done in the wrapper so the kernel
    # output stays lane-dense (B, 128) instead of a masked (B, 1) store.
    return h_last @ w_lin.T + b_lin


def _reference(x, w_ih, w_hh, b_ih, b_hh, w_lin, b_lin):
    """Pure-JAX f32 reference matching torch.nn.LSTM + Linear semantics."""
    T, B, _ = x.shape
    H = HIDDEN

    def step(carry, x_t):
        h, c = carry
        gates = x_t @ w_ih.T + h @ w_hh.T + b_ih + b_hh
        i = jax.nn.sigmoid(gates[:, 0 * H:1 * H])
        f = jax.nn.sigmoid(gates[:, 1 * H:2 * H])
        g = jnp.tanh(gates[:, 2 * H:3 * H])
        o = jax.nn.sigmoid(gates[:, 3 * H:4 * H])
        c = f * c + i * g
        h = o * jnp.tanh(c)
        return (h, c), h

    h0 = jnp.zeros((B, H), jnp.float32)
    c0 = jnp.zeros((B, H), jnp.float32)
    (h_last, _), _ = jax.lax.scan(step, (h0, c0), x)
    return h_last @ w_lin.T + b_lin


if __name__ == "__main__":
    key = jax.random.PRNGKey(0)
    T, B = 16, 8    # small seq/batch; B multiple of 8 for sublane tiling

    ks = jax.random.split(key, 7)
    bound = 1.0 / (HIDDEN ** 0.5)   # PyTorch default uniform init range

    x = jax.random.normal(ks[0], (T, B, INPUT_SIZE), jnp.float32)
    w_ih = jax.random.uniform(ks[1], (4 * HIDDEN, INPUT_SIZE), jnp.float32,
                              -bound, bound)
    w_hh = jax.random.uniform(ks[2], (4 * HIDDEN, HIDDEN), jnp.float32,
                              -bound, bound)
    b_ih = jax.random.uniform(ks[3], (4 * HIDDEN,), jnp.float32, -bound, bound)
    b_hh = jax.random.uniform(ks[4], (4 * HIDDEN,), jnp.float32, -bound, bound)
    w_lin = jax.random.uniform(ks[5], (OUTPUT, HIDDEN), jnp.float32,
                               -bound, bound)
    b_lin = jax.random.uniform(ks[6], (OUTPUT,), jnp.float32, -bound, bound)

    preds = lstm_forward(x, w_ih, w_hh, b_ih, b_hh, w_lin, b_lin)
    preds = jax.block_until_ready(preds)

    ref = _reference(x, w_ih, w_hh, b_ih, b_hh, w_lin, b_lin)
    assert preds.shape == (B, OUTPUT)
    # Tolerance accounts for bf16 MXU operands (f32 accumulation) in the
    # recurrent matmul vs. the all-f32 reference.
    assert jnp.allclose(preds, ref, atol=3e-2, rtol=3e-2), "mismatch vs reference"

    print("KERNEL_OK")
</pallas_src>

<mosaic_0001>
module attributes {stable_mosaic.version = 11 : i64} {
  func.func @_lstm_kernel(%arg0: memref<16x8x512xf32, #tpu.memory_space<vmem>>, %arg1: memref<128x512xbf16, #tpu.memory_space<vmem>>, %arg2: memref<8x128xf32, #tpu.memory_space<vmem>>) attributes {dimension_semantics = [], scalar_prefetch = 0 : i64, scratch_operands = 0 : i64, tpu.core_type = #tpu.core_type<tc>} {
    %c0 = arith.constant 0 : index
    %c0_0 = arith.constant 0 : index
    %0 = vector.load %arg1[%c0, %c0_0] : memref<128x512xbf16, #tpu.memory_space<vmem>>, vector<128x512xbf16>
    %cst = arith.constant 0.000000e+00 : f32
    %1 = vector.broadcast %cst : f32 to vector<8x128xf32>
    %cst_1 = arith.constant 0.000000e+00 : f32
    %2 = vector.broadcast %cst_1 : f32 to vector<8x128xf32>
    %c0_i32 = arith.constant 0 : i32
    %3 = arith.index_cast %c0_i32 : i32 to index
    %c0_2 = arith.constant 0 : index
    %c0_3 = arith.constant 0 : index
    %4 = vector.load %arg0[%3, %c0_2, %c0_3] : memref<16x8x512xf32, #tpu.memory_space<vmem>>, vector<1x8x512xf32>
    %5 = vector.shape_cast %4 : vector<1x8x512xf32> to vector<8x512xf32>
    %6 = arith.truncf %1 : vector<8x128xf32> to vector<8x128xbf16>
    %cst_4 = arith.constant dense<0.000000e+00> : vector<8x512xf32>
    %7 = tpu.matmul %6, %0, %cst_4 {dimension_numbers = #tpu.dot_dimension_numbers<[1], [0], [0], [1], [0, 0, 1, 1], [], []>} : vector<8x128xbf16>, vector<128x512xbf16>, vector<8x512xf32> -> vector<8x512xf32>
    %8 = arith.addf %5, %7 : vector<8x512xf32>
    %9 = math.tanh %8 : vector<8x512xf32>
    %10 = vector.extract_strided_slice %9 {offsets = [0, 0], sizes = [8, 384], strides = [1, 1]} : vector<8x512xf32> to vector<8x384xf32>
    %cst_5 = arith.constant 5.000000e-01 : f32
    %11 = vector.broadcast %cst_5 : f32 to vector<8x384xf32>
    %12 = arith.mulf %11, %10 : vector<8x384xf32>
    %cst_6 = arith.constant 5.000000e-01 : f32
    %13 = vector.broadcast %cst_6 : f32 to vector<8x384xf32>
    %14 = arith.addf %12, %13 : vector<8x384xf32>
    %15 = vector.extract_strided_slice %14 {offsets = [0, 0], sizes = [8, 128], strides = [1, 1]} : vector<8x384xf32> to vector<8x128xf32>
    %16 = vector.extract_strided_slice %14 {offsets = [0, 128], sizes = [8, 128], strides = [1, 1]} : vector<8x384xf32> to vector<8x128xf32>
    %17 = vector.extract_strided_slice %14 {offsets = [0, 256], sizes = [8, 128], strides = [1, 1]} : vector<8x384xf32> to vector<8x128xf32>
    %18 = vector.extract_strided_slice %9 {offsets = [0, 384], sizes = [8, 128], strides = [1, 1]} : vector<8x512xf32> to vector<8x128xf32>
    %19 = arith.mulf %16, %2 : vector<8x128xf32>
    %20 = arith.mulf %15, %18 : vector<8x128xf32>
    %21 = arith.addf %19, %20 : vector<8x128xf32>
    %22 = math.tanh %21 : vector<8x128xf32>
    %23 = arith.mulf %17, %22 : vector<8x128xf32>
    %c1_i32 = arith.constant 1 : i32
    %24 = arith.index_cast %c1_i32 : i32 to index
    %c0_7 = arith.constant 0 : index
    %c0_8 = arith.constant 0 : index
    %25 = vector.load %arg0[%24, %c0_7, %c0_8] : memref<16x8x512xf32, #tpu.memory_space<vmem>>, vector<1x8x512xf32>
    %26 = vector.shape_cast %25 : vector<1x8x512xf32> to vector<8x512xf32>
    %27 = arith.truncf %23 : vector<8x128xf32> to vector<8x128xbf16>
    %cst_9 = arith.constant dense<0.000000e+00> : vector<8x512xf32>
    %28 = tpu.matmul %27, %0, %cst_9 {dimension_numbers = #tpu.dot_dimension_numbers<[1], [0], [0], [1], [0, 0, 1, 1], [], []>} : vector<8x128xbf16>, vector<128x512xbf16>, vector<8x512xf32> -> vector<8x512xf32>
    %29 = arith.addf %26, %28 : vector<8x512xf32>
    %30 = math.tanh %29 : vector<8x512xf32>
    %31 = vector.extract_strided_slice %30 {offsets = [0, 0], sizes = [8, 384], strides = [1, 1]} : vector<8x512xf32> to vector<8x384xf32>
    %cst_10 = arith.constant 5.000000e-01 : f32
    %32 = vector.broadcast %cst_10 : f32 to vector<8x384xf32>
    %33 = arith.mulf %32, %31 : vector<8x384xf32>
    %cst_11 = arith.constant 5.000000e-01 : f32
    %34 = vector.broadcast %cst_11 : f32 to vector<8x384xf32>
    %35 = arith.addf %33, %34 : vector<8x384xf32>
    %36 = vector.extract_strided_slice %35 {offsets = [0, 0], sizes = [8, 128], strides = [1, 1]} : vector<8x384xf32> to vector<8x128xf32>
    %37 = vector.extract_strided_slice %35 {offsets = [0, 128], sizes = [8, 128], strides = [1, 1]} : vector<8x384xf32> to vector<8x128xf32>
    %38 = vector.extract_strided_slice %35 {offsets = [0, 256], sizes = [8, 128], strides = [1, 1]} : vector<8x384xf32> to vector<8x128xf32>
    %39 = vector.extract_strided_slice %30 {offsets = [0, 384], sizes = [8, 128], strides = [1, 1]} : vector<8x512xf32> to vector<8x128xf32>
    %40 = arith.mulf %37, %21 : vector<8x128xf32>
    %41 = arith.mulf %36, %39 : vector<8x128xf32>
    %42 = arith.addf %40, %41 : vector<8x128xf32>
    %43 = math.tanh %42 : vector<8x128xf32>
    %44 = arith.mulf %38, %43 : vector<8x128xf32>
    %c2_i32 = arith.constant 2 : i32
    %45 = arith.index_cast %c2_i32 : i32 to index
    %c0_12 = arith.constant 0 : index
    %c0_13 = arith.constant 0 : index
    %46 = vector.load %arg0[%45, %c0_12, %c0_13] : memref<16x8x512xf32, #tpu.memory_space<vmem>>, vector<1x8x512xf32>
    %47 = vector.shape_cast %46 : vector<1x8x512xf32> to vector<8x512xf32>
    %48 = arith.truncf %44 : vector<8x128xf32> to vector<8x128xbf16>
    %cst_14 = arith.constant dense<0.000000e+00> : vector<8x512xf32>
    %49 = tpu.matmul %48, %0, %cst_14 {dimension_numbers = #tpu.dot_dimension_numbers<[1], [0], [0], [1], [0, 0, 1, 1], [], []>} : vector<8x128xbf16>, vector<128x512xbf16>, vector<8x512xf32> -> vector<8x512xf32>
    %50 = arith.addf %47, %49 : vector<8x512xf32>
    %51 = math.tanh %50 : vector<8x512xf32>
    %52 = vector.extract_strided_slice %51 {offsets = [0, 0], sizes = [8, 384], strides = [1, 1]} : vector<8x512xf32> to vector<8x384xf32>
    %cst_15 = arith.constant 5.000000e-01 : f32
    %53 = vector.broadcast %cst_15 : f32 to vector<8x384xf32>
    %54 = arith.mulf %53, %52 : vector<8x384xf32>
    %cst_16 = arith.constant 5.000000e-01 : f32
    %55 = vector.broadcast %cst_16 : f32 to vector<8x384xf32>
    %56 = arith.addf %54, %55 : vector<8x384xf32>
    %57 = vector.extract_strided_slice %56 {offsets = [0, 0], sizes = [8, 128], strides = [1, 1]} : vector<8x384xf32> to vector<8x128xf32>
    %58 = vector.extract_strided_slice %56 {offsets = [0, 128], sizes = [8, 128], strides = [1, 1]} : vector<8x384xf32> to vector<8x128xf32>
    %59 = vector.extract_strided_slice %56 {offsets = [0, 256], sizes = [8, 128], strides = [1, 1]} : vector<8x384xf32> to vector<8x128xf32>
    %60 = vector.extract_strided_slice %51 {offsets = [0, 384], sizes = [8, 128], strides = [1, 1]} : vector<8x512xf32> to vector<8x128xf32>
    %61 = arith.mulf %58, %42 : vector<8x128xf32>
    %62 = arith.mulf %57, %60 : vector<8x128xf32>
    %63 = arith.addf %61, %62 : vector<8x128xf32>
    %64 = math.tanh %63 : vector<8x128xf32>
    %65 = arith.mulf %59, %64 : vector<8x128xf32>
    %c3_i32 = arith.constant 3 : i32
    %66 = arith.index_cast %c3_i32 : i32 to index
    %c0_17 = arith.constant 0 : index
    %c0_18 = arith.constant 0 : index
    %67 = vector.load %arg0[%66, %c0_17, %c0_18] : memref<16x8x512xf32, #tpu.memory_space<vmem>>, vector<1x8x512xf32>
    %68 = vector.shape_cast %67 : vector<1x8x512xf32> to vector<8x512xf32>
    %69 = arith.truncf %65 : vector<8x128xf32> to vector<8x128xbf16>
    %cst_19 = arith.constant dense<0.000000e+00> : vector<8x512xf32>
    %70 = tpu.matmul %69, %0, %cst_19 {dimension_numbers = #tpu.dot_dimension_numbers<[1], [0], [0], [1], [0, 0, 1, 1], [], []>} : vector<8x128xbf16>, vector<128x512xbf16>, vector<8x512xf32> -> vector<8x512xf32>
    %71 = arith.addf %68, %70 : vector<8x512xf32>
    %72 = math.tanh %71 : vector<8x512xf32>
    %73 = vector.extract_strided_slice %72 {offsets = [0, 0], sizes = [8, 384], strides = [1, 1]} : vector<8x512xf32> to vector<8x384xf32>
    %cst_20 = arith.constant 5.000000e-01 : f32
    %74 = vector.broadcast %cst_20 : f32 to vector<8x384xf32>
    %75 = arith.mulf %74, %73 : vector<8x384xf32>
    %cst_21 = arith.constant 5.000000e-01 : f32
    %76 = vector.broadcast %cst_21 : f32 to vector<8x384xf32>
    %77 = arith.addf %75, %76 : vector<8x384xf32>
    %78 = vector.extract_strided_slice %77 {offsets = [0, 0], sizes = [8, 128], strides = [1, 1]} : vector<8x384xf32> to vector<8x128xf32>
    %79 = vector.extract_strided_slice %77 {offsets = [0, 128], sizes = [8, 128], strides = [1, 1]} : vector<8x384xf32> to vector<8x128xf32>
    %80 = vector.extract_strided_slice %77 {offsets = [0, 256], sizes = [8, 128], strides = [1, 1]} : vector<8x384xf32> to vector<8x128xf32>
    %81 = vector.extract_strided_slice %72 {offsets = [0, 384], sizes = [8, 128], strides = [1, 1]} : vector<8x512xf32> to vector<8x128xf32>
    %82 = arith.mulf %79, %63 : vector<8x128xf32>
    %83 = arith.mulf %78, %81 : vector<8x128xf32>
    %84 = arith.addf %82, %83 : vector<8x128xf32>
    %85 = math.tanh %84 : vector<8x128xf32>
    %86 = arith.mulf %80, %85 : vector<8x128xf32>
    %c4_i32 = arith.constant 4 : i32
    %87 = arith.index_cast %c4_i32 : i32 to index
    %c0_22 = arith.constant 0 : index
    %c0_23 = arith.constant 0 : index
    %88 = vector.load %arg0[%87, %c0_22, %c0_23] : memref<16x8x512xf32, #tpu.memory_space<vmem>>, vector<1x8x512xf32>
    %89 = vector.shape_cast %88 : vector<1x8x512xf32> to vector<8x512xf32>
    %90 = arith.truncf %86 : vector<8x128xf32> to vector<8x128xbf16>
    %cst_24 = arith.constant dense<0.000000e+00> : vector<8x512xf32>
    %91 = tpu.matmul %90, %0, %cst_24 {dimension_numbers = #tpu.dot_dimension_numbers<[1], [0], [0], [1], [0, 0, 1, 1], [], []>} : vector<8x128xbf16>, vector<128x512xbf16>, vector<8x512xf32> -> vector<8x512xf32>
    %92 = arith.addf %89, %91 : vector<8x512xf32>
    %93 = math.tanh %92 : vector<8x512xf32>
    %94 = vector.extract_strided_slice %93 {offsets = [0, 0], sizes = [8, 384], strides = [1, 1]} : vector<8x512xf32> to vector<8x384xf32>
    %cst_25 = arith.constant 5.000000e-01 : f32
    %95 = vector.broadcast %cst_25 : f32 to vector<8x384xf32>
    %96 = arith.mulf %95, %94 : vector<8x384xf32>
    %cst_26 = arith.constant 5.000000e-01 : f32
    %97 = vector.broadcast %cst_26 : f32 to vector<8x384xf32>
    %98 = arith.addf %96, %97 : vector<8x384xf32>
    %99 = vector.extract_strided_slice %98 {offsets = [0, 0], sizes = [8, 128], strides = [1, 1]} : vector<8x384xf32> to vector<8x128xf32>
    %100 = vector.extract_strided_slice %98 {offsets = [0, 128], sizes = [8, 128], strides = [1, 1]} : vector<8x384xf32> to vector<8x128xf32>
    %101 = vector.extract_strided_slice %98 {offsets = [0, 256], sizes = [8, 128], strides = [1, 1]} : vector<8x384xf32> to vector<8x128xf32>
    %102 = vector.extract_strided_slice %93 {offsets = [0, 384], sizes = [8, 128], strides = [1, 1]} : vector<8x512xf32> to vector<8x128xf32>
    %103 = arith.mulf %100, %84 : vector<8x128xf32>
    %104 = arith.mulf %99, %102 : vector<8x128xf32>
    %105 = arith.addf %103, %104 : vector<8x128xf32>
    %106 = math.tanh %105 : vector<8x128xf32>
    %107 = arith.mulf %101, %106 : vector<8x128xf32>
    %c5_i32 = arith.constant 5 : i32
    %108 = arith.index_cast %c5_i32 : i32 to index
    %c0_27 = arith.constant 0 : index
    %c0_28 = arith.constant 0 : index
    %109 = vector.load %arg0[%108, %c0_27, %c0_28] : memref<16x8x512xf32, #tpu.memory_space<vmem>>, vector<1x8x512xf32>
    %110 = vector.shape_cast %109 : vector<1x8x512xf32> to vector<8x512xf32>
    %111 = arith.truncf %107 : vector<8x128xf32> to vector<8x128xbf16>
    %cst_29 = arith.constant dense<0.000000e+00> : vector<8x512xf32>
    %112 = tpu.matmul %111, %0, %cst_29 {dimension_numbers = #tpu.dot_dimension_numbers<[1], [0], [0], [1], [0, 0, 1, 1], [], []>} : vector<8x128xbf16>, vector<128x512xbf16>, vector<8x512xf32> -> vector<8x512xf32>
    %113 = arith.addf %110, %112 : vector<8x512xf32>
    %114 = math.tanh %113 : vector<8x512xf32>
    %115 = vector.extract_strided_slice %114 {offsets = [0, 0], sizes = [8, 384], strides = [1, 1]} : vector<8x512xf32> to vector<8x384xf32>
    %cst_30 = arith.constant 5.000000e-01 : f32
    %116 = vector.broadcast %cst_30 : f32 to vector<8x384xf32>
    %117 = arith.mulf %116, %115 : vector<8x384xf32>
    %cst_31 = arith.constant 5.000000e-01 : f32
    %118 = vector.broadcast %cst_31 : f32 to vector<8x384xf32>
    %119 = arith.addf %117, %118 : vector<8x384xf32>
    %120 = vector.extract_strided_slice %119 {offsets = [0, 0], sizes = [8, 128], strides = [1, 1]} : vector<8x384xf32> to vector<8x128xf32>
    %121 = vector.extract_strided_slice %119 {offsets = [0, 128], sizes = [8, 128], strides = [1, 1]} : vector<8x384xf32> to vector<8x128xf32>
    %122 = vector.extract_strided_slice %119 {offsets = [0, 256], sizes = [8, 128], strides = [1, 1]} : vector<8x384xf32> to vector<8x128xf32>
    %123 = vector.extract_strided_slice %114 {offsets = [0, 384], sizes = [8, 128], strides = [1, 1]} : vector<8x512xf32> to vector<8x128xf32>
    %124 = arith.mulf %121, %105 : vector<8x128xf32>
    %125 = arith.mulf %120, %123 : vector<8x128xf32>
    %126 = arith.addf %124, %125 : vector<8x128xf32>
    %127 = math.tanh %126 : vector<8x128xf32>
    %128 = arith.mulf %122, %127 : vector<8x128xf32>
    %c6_i32 = arith.constant 6 : i32
    %129 = arith.index_cast %c6_i32 : i32 to index
    %c0_32 = arith.constant 0 : index
    %c0_33 = arith.constant 0 : index
    %130 = vector.load %arg0[%129, %c0_32, %c0_33] : memref<16x8x512xf32, #tpu.memory_space<vmem>>, vector<1x8x512xf32>
    %131 = vector.shape_cast %130 : vector<1x8x512xf32> to vector<8x512xf32>
    %132 = arith.truncf %128 : vector<8x128xf32> to vector<8x128xbf16>
    %cst_34 = arith.constant dense<0.000000e+00> : vector<8x512xf32>
    %133 = tpu.matmul %132, %0, %cst_34 {dimension_numbers = #tpu.dot_dimension_numbers<[1], [0], [0], [1], [0, 0, 1, 1], [], []>} : vector<8x128xbf16>, vector<128x512xbf16>, vector<8x512xf32> -> vector<8x512xf32>
    %134 = arith.addf %131, %133 : vector<8x512xf32>
    %135 = math.tanh %134 : vector<8x512xf32>
    %136 = vector.extract_strided_slice %135 {offsets = [0, 0], sizes = [8, 384], strides = [1, 1]} : vector<8x512xf32> to vector<8x384xf32>
    %cst_35 = arith.constant 5.000000e-01 : f32
    %137 = vector.broadcast %cst_35 : f32 to vector<8x384xf32>
    %138 = arith.mulf %137, %136 : vector<8x384xf32>
    %cst_36 = arith.constant 5.000000e-01 : f32
    %139 = vector.broadcast %cst_36 : f32 to vector<8x384xf32>
    %140 = arith.addf %138, %139 : vector<8x384xf32>
    %141 = vector.extract_strided_slice %140 {offsets = [0, 0], sizes = [8, 128], strides = [1, 1]} : vector<8x384xf32> to vector<8x128xf32>
    %142 = vector.extract_strided_slice %140 {offsets = [0, 128], sizes = [8, 128], strides = [1, 1]} : vector<8x384xf32> to vector<8x128xf32>
    %143 = vector.extract_strided_slice %140 {offsets = [0, 256], sizes = [8, 128], strides = [1, 1]} : vector<8x384xf32> to vector<8x128xf32>
    %144 = vector.extract_strided_slice %135 {offsets = [0, 384], sizes = [8, 128], strides = [1, 1]} : vector<8x512xf32> to vector<8x128xf32>
    %145 = arith.mulf %142, %126 : vector<8x128xf32>
    %146 = arith.mulf %141, %144 : vector<8x128xf32>
    %147 = arith.addf %145, %146 : vector<8x128xf32>
    %148 = math.tanh %147 : vector<8x128xf32>
    %149 = arith.mulf %143, %148 : vector<8x128xf32>
    %c7_i32 = arith.constant 7 : i32
    %150 = arith.index_cast %c7_i32 : i32 to index
    %c0_37 = arith.constant 0 : index
    %c0_38 = arith.constant 0 : index
    %151 = vector.load %arg0[%150, %c0_37, %c0_38] : memref<16x8x512xf32, #tpu.memory_space<vmem>>, vector<1x8x512xf32>
    %152 = vector.shape_cast %151 : vector<1x8x512xf32> to vector<8x512xf32>
    %153 = arith.truncf %149 : vector<8x128xf32> to vector<8x128xbf16>
    %cst_39 = arith.constant dense<0.000000e+00> : vector<8x512xf32>
    %154 = tpu.matmul %153, %0, %cst_39 {dimension_numbers = #tpu.dot_dimension_numbers<[1], [0], [0], [1], [0, 0, 1, 1], [], []>} : vector<8x128xbf16>, vector<128x512xbf16>, vector<8x512xf32> -> vector<8x512xf32>
    %155 = arith.addf %152, %154 : vector<8x512xf32>
    %156 = math.tanh %155 : vector<8x512xf32>
    %157 = vector.extract_strided_slice %156 {offsets = [0, 0], sizes = [8, 384], strides = [1, 1]} : vector<8x512xf32> to vector<8x384xf32>
    %cst_40 = arith.constant 5.000000e-01 : f32
    %158 = vector.broadcast %cst_40 : f32 to vector<8x384xf32>
    %159 = arith.mulf %158, %157 : vector<8x384xf32>
    %cst_41 = arith.constant 5.000000e-01 : f32
    %160 = vector.broadcast %cst_41 : f32 to vector<8x384xf32>
    %161 = arith.addf %159, %160 : vector<8x384xf32>
    %162 = vector.extract_strided_slice %161 {offsets = [0, 0], sizes = [8, 128], strides = [1, 1]} : vector<8x384xf32> to vector<8x128xf32>
    %163 = vector.extract_strided_slice %161 {offsets = [0, 128], sizes = [8, 128], strides = [1, 1]} : vector<8x384xf32> to vector<8x128xf32>
    %164 = vector.extract_strided_slice %161 {offsets = [0, 256], sizes = [8, 128], strides = [1, 1]} : vector<8x384xf32> to vector<8x128xf32>
    %165 = vector.extract_strided_slice %156 {offsets = [0, 384], sizes = [8, 128], strides = [1, 1]} : vector<8x512xf32> to vector<8x128xf32>
    %166 = arith.mulf %163, %147 : vector<8x128xf32>
    %167 = arith.mulf %162, %165 : vector<8x128xf32>
    %168 = arith.addf %166, %167 : vector<8x128xf32>
    %169 = math.tanh %168 : vector<8x128xf32>
    %170 = arith.mulf %164, %169 : vector<8x128xf32>
    %c8_i32 = arith.constant 8 : i32
    %171 = arith.index_cast %c8_i32 : i32 to index
    %c0_42 = arith.constant 0 : index
    %c0_43 = arith.constant 0 : index
    %172 = vector.load %arg0[%171, %c0_42, %c0_43] : memref<16x8x512xf32, #tpu.memory_space<vmem>>, vector<1x8x512xf32>
    %173 = vector.shape_cast %172 : vector<1x8x512xf32> to vector<8x512xf32>
    %174 = arith.truncf %170 : vector<8x128xf32> to vector<8x128xbf16>
    %cst_44 = arith.constant dense<0.000000e+00> : vector<8x512xf32>
    %175 = tpu.matmul %174, %0, %cst_44 {dimension_numbers = #tpu.dot_dimension_numbers<[1], [0], [0], [1], [0, 0, 1, 1], [], []>} : vector<8x128xbf16>, vector<128x512xbf16>, vector<8x512xf32> -> vector<8x512xf32>
    %176 = arith.addf %173, %175 : vector<8x512xf32>
    %177 = math.tanh %176 : vector<8x512xf32>
    %178 = vector.extract_strided_slice %177 {offsets = [0, 0], sizes = [8, 384], strides = [1, 1]} : vector<8x512xf32> to vector<8x384xf32>
    %cst_45 = arith.constant 5.000000e-01 : f32
    %179 = vector.broadcast %cst_45 : f32 to vector<8x384xf32>
    %180 = arith.mulf %179, %178 : vector<8x384xf32>
    %cst_46 = arith.constant 5.000000e-01 : f32
    %181 = vector.broadcast %cst_46 : f32 to vector<8x384xf32>
    %182 = arith.addf %180, %181 : vector<8x384xf32>
    %183 = vector.extract_strided_slice %182 {offsets = [0, 0], sizes = [8, 128], strides = [1, 1]} : vector<8x384xf32> to vector<8x128xf32>
    %184 = vector.extract_strided_slice %182 {offsets = [0, 128], sizes = [8, 128], strides = [1, 1]} : vector<8x384xf32> to vector<8x128xf32>
    %185 = vector.extract_strided_slice %182 {offsets = [0, 256], sizes = [8, 128], strides = [1, 1]} : vector<8x384xf32> to vector<8x128xf32>
    %186 = vector.extract_strided_slice %177 {offsets = [0, 384], sizes = [8, 128], strides = [1, 1]} : vector<8x512xf32> to vector<8x128xf32>
    %187 = arith.mulf %184, %168 : vector<8x128xf32>
    %188 = arith.mulf %183, %186 : vector<8x128xf32>
    %189 = arith.addf %187, %188 : vector<8x128xf32>
    %190 = math.tanh %189 : vector<8x128xf32>
    %191 = arith.mulf %185, %190 : vector<8x128xf32>
    %c9_i32 = arith.constant 9 : i32
    %192 = arith.index_cast %c9_i32 : i32 to index
    %c0_47 = arith.constant 0 : index
    %c0_48 = arith.constant 0 : index
    %193 = vector.load %arg0[%192, %c0_47, %c0_48] : memref<16x8x512xf32, #tpu.memory_space<vmem>>, vector<1x8x512xf32>
    %194 = vector.shape_cast %193 : vector<1x8x512xf32> to vector<8x512xf32>
    %195 = arith.truncf %191 : vector<8x128xf32> to vector<8x128xbf16>
    %cst_49 = arith.constant dense<0.000000e+00> : vector<8x512xf32>
    %196 = tpu.matmul %195, %0, %cst_49 {dimension_numbers = #tpu.dot_dimension_numbers<[1], [0], [0], [1], [0, 0, 1, 1], [], []>} : vector<8x128xbf16>, vector<128x512xbf16>, vector<8x512xf32> -> vector<8x512xf32>
    %197 = arith.addf %194, %196 : vector<8x512xf32>
    %198 = math.tanh %197 : vector<8x512xf32>
    %199 = vector.extract_strided_slice %198 {offsets = [0, 0], sizes = [8, 384], strides = [1, 1]} : vector<8x512xf32> to vector<8x384xf32>
    %cst_50 = arith.constant 5.000000e-01 : f32
    %200 = vector.broadcast %cst_50 : f32 to vector<8x384xf32>
    %201 = arith.mulf %200, %199 : vector<8x384xf32>
    %cst_51 = arith.constant 5.000000e-01 : f32
    %202 = vector.broadcast %cst_51 : f32 to vector<8x384xf32>
    %203 = arith.addf %201, %202 : vector<8x384xf32>
    %204 = vector.extract_strided_slice %203 {offsets = [0, 0], sizes = [8, 128], strides = [1, 1]} : vector<8x384xf32> to vector<8x128xf32>
    %205 = vector.extract_strided_slice %203 {offsets = [0, 128], sizes = [8, 128], strides = [1, 1]} : vector<8x384xf32> to vector<8x128xf32>
    %206 = vector.extract_strided_slice %203 {offsets = [0, 256], sizes = [8, 128], strides = [1, 1]} : vector<8x384xf32> to vector<8x128xf32>
    %207 = vector.extract_strided_slice %198 {offsets = [0, 384], sizes = [8, 128], strides = [1, 1]} : vector<8x512xf32> to vector<8x128xf32>
    %208 = arith.mulf %205, %189 : vector<8x128xf32>
    %209 = arith.mulf %204, %207 : vector<8x128xf32>
    %210 = arith.addf %208, %209 : vector<8x128xf32>
    %211 = math.tanh %210 : vector<8x128xf32>
    %212 = arith.mulf %206, %211 : vector<8x128xf32>
    %c10_i32 = arith.constant 10 : i32
    %213 = arith.index_cast %c10_i32 : i32 to index
    %c0_52 = arith.constant 0 : index
    %c0_53 = arith.constant 0 : index
    %214 = vector.load %arg0[%213, %c0_52, %c0_53] : memref<16x8x512xf32, #tpu.memory_space<vmem>>, vector<1x8x512xf32>
    %215 = vector.shape_cast %214 : vector<1x8x512xf32> to vector<8x512xf32>
    %216 = arith.truncf %212 : vector<8x128xf32> to vector<8x128xbf16>
    %cst_54 = arith.constant dense<0.000000e+00> : vector<8x512xf32>
    %217 = tpu.matmul %216, %0, %cst_54 {dimension_numbers = #tpu.dot_dimension_numbers<[1], [0], [0], [1], [0, 0, 1, 1], [], []>} : vector<8x128xbf16>, vector<128x512xbf16>, vector<8x512xf32> -> vector<8x512xf32>
    %218 = arith.addf %215, %217 : vector<8x512xf32>
    %219 = math.tanh %218 : vector<8x512xf32>
    %220 = vector.extract_strided_slice %219 {offsets = [0, 0], sizes = [8, 384], strides = [1, 1]} : vector<8x512xf32> to vector<8x384xf32>
    %cst_55 = arith.constant 5.000000e-01 : f32
    %221 = vector.broadcast %cst_55 : f32 to vector<8x384xf32>
    %222 = arith.mulf %221, %220 : vector<8x384xf32>
    %cst_56 = arith.constant 5.000000e-01 : f32
    %223 = vector.broadcast %cst_56 : f32 to vector<8x384xf32>
    %224 = arith.addf %222, %223 : vector<8x384xf32>
    %225 = vector.extract_strided_slice %224 {offsets = [0, 0], sizes = [8, 128], strides = [1, 1]} : vector<8x384xf32> to vector<8x128xf32>
    %226 = vector.extract_strided_slice %224 {offsets = [0, 128], sizes = [8, 128], strides = [1, 1]} : vector<8x384xf32> to vector<8x128xf32>
    %227 = vector.extract_strided_slice %224 {offsets = [0, 256], sizes = [8, 128], strides = [1, 1]} : vector<8x384xf32> to vector<8x128xf32>
    %228 = vector.extract_strided_slice %219 {offsets = [0, 384], sizes = [8, 128], strides = [1, 1]} : vector<8x512xf32> to vector<8x128xf32>
    %229 = arith.mulf %226, %210 : vector<8x128xf32>
    %230 = arith.mulf %225, %228 : vector<8x128xf32>
    %231 = arith.addf %229, %230 : vector<8x128xf32>
    %232 = math.tanh %231 : vector<8x128xf32>
    %233 = arith.mulf %227, %232 : vector<8x128xf32>
    %c11_i32 = arith.constant 11 : i32
    %234 = arith.index_cast %c11_i32 : i32 to index
    %c0_57 = arith.constant 0 : index
    %c0_58 = arith.constant 0 : index
    %235 = vector.load %arg0[%234, %c0_57, %c0_58] : memref<16x8x512xf32, #tpu.memory_space<vmem>>, vector<1x8x512xf32>
    %236 = vector.shape_cast %235 : vector<1x8x512xf32> to vector<8x512xf32>
    %237 = arith.truncf %233 : vector<8x128xf32> to vector<8x128xbf16>
    %cst_59 = arith.constant dense<0.000000e+00> : vector<8x512xf32>
    %238 = tpu.matmul %237, %0, %cst_59 {dimension_numbers = #tpu.dot_dimension_numbers<[1], [0], [0], [1], [0, 0, 1, 1], [], []>} : vector<8x128xbf16>, vector<128x512xbf16>, vector<8x512xf32> -> vector<8x512xf32>
    %239 = arith.addf %236, %238 : vector<8x512xf32>
    %240 = math.tanh %239 : vector<8x512xf32>
    %241 = vector.extract_strided_slice %240 {offsets = [0, 0], sizes = [8, 384], strides = [1, 1]} : vector<8x512xf32> to vector<8x384xf32>
    %cst_60 = arith.constant 5.000000e-01 : f32
    %242 = vector.broadcast %cst_60 : f32 to vector<8x384xf32>
    %243 = arith.mulf %242, %241 : vector<8x384xf32>
    %cst_61 = arith.constant 5.000000e-01 : f32
    %244 = vector.broadcast %cst_61 : f32 to vector<8x384xf32>
    %245 = arith.addf %243, %244 : vector<8x384xf32>
    %246 = vector.extract_strided_slice %245 {offsets = [0, 0], sizes = [8, 128], strides = [1, 1]} : vector<8x384xf32> to vector<8x128xf32>
    %247 = vector.extract_strided_slice %245 {offsets = [0, 128], sizes = [8, 128], strides = [1, 1]} : vector<8x384xf32> to vector<8x128xf32>
    %248 = vector.extract_strided_slice %245 {offsets = [0, 256], sizes = [8, 128], strides = [1, 1]} : vector<8x384xf32> to vector<8x128xf32>
    %249 = vector.extract_strided_slice %240 {offsets = [0, 384], sizes = [8, 128], strides = [1, 1]} : vector<8x512xf32> to vector<8x128xf32>
    %250 = arith.mulf %247, %231 : vector<8x128xf32>
    %251 = arith.mulf %246, %249 : vector<8x128xf32>
    %252 = arith.addf %250, %251 : vector<8x128xf32>
    %253 = math.tanh %252 : vector<8x128xf32>
    %254 = arith.mulf %248, %253 : vector<8x128xf32>
    %c12_i32 = arith.constant 12 : i32
    %255 = arith.index_cast %c12_i32 : i32 to index
    %c0_62 = arith.constant 0 : index
    %c0_63 = arith.constant 0 : index
    %256 = vector.load %arg0[%255, %c0_62, %c0_63] : memref<16x8x512xf32, #tpu.memory_space<vmem>>, vector<1x8x512xf32>
    %257 = vector.shape_cast %256 : vector<1x8x512xf32> to vector<8x512xf32>
    %258 = arith.truncf %254 : vector<8x128xf32> to vector<8x128xbf16>
    %cst_64 = arith.constant dense<0.000000e+00> : vector<8x512xf32>
    %259 = tpu.matmul %258, %0, %cst_64 {dimension_numbers = #tpu.dot_dimension_numbers<[1], [0], [0], [1], [0, 0, 1, 1], [], []>} : vector<8x128xbf16>, vector<128x512xbf16>, vector<8x512xf32> -> vector<8x512xf32>
    %260 = arith.addf %257, %259 : vector<8x512xf32>
    %261 = math.tanh %260 : vector<8x512xf32>
    %262 = vector.extract_strided_slice %261 {offsets = [0, 0], sizes = [8, 384], strides = [1, 1]} : vector<8x512xf32> to vector<8x384xf32>
    %cst_65 = arith.constant 5.000000e-01 : f32
    %263 = vector.broadcast %cst_65 : f32 to vector<8x384xf32>
    %264 = arith.mulf %263, %262 : vector<8x384xf32>
    %cst_66 = arith.constant 5.000000e-01 : f32
    %265 = vector.broadcast %cst_66 : f32 to vector<8x384xf32>
    %266 = arith.addf %264, %265 : vector<8x384xf32>
    %267 = vector.extract_strided_slice %266 {offsets = [0, 0], sizes = [8, 128], strides = [1, 1]} : vector<8x384xf32> to vector<8x128xf32>
    %268 = vector.extract_strided_slice %266 {offsets = [0, 128], sizes = [8, 128], strides = [1, 1]} : vector<8x384xf32> to vector<8x128xf32>
    %269 = vector.extract_strided_slice %266 {offsets = [0, 256], sizes = [8, 128], strides = [1, 1]} : vector<8x384xf32> to vector<8x128xf32>
    %270 = vector.extract_strided_slice %261 {offsets = [0, 384], sizes = [8, 128], strides = [1, 1]} : vector<8x512xf32> to vector<8x128xf32>
    %271 = arith.mulf %268, %252 : vector<8x128xf32>
    %272 = arith.mulf %267, %270 : vector<8x128xf32>
    %273 = arith.addf %271, %272 : vector<8x128xf32>
    %274 = math.tanh %273 : vector<8x128xf32>
    %275 = arith.mulf %269, %274 : vector<8x128xf32>
    %c13_i32 = arith.constant 13 : i32
    %276 = arith.index_cast %c13_i32 : i32 to index
    %c0_67 = arith.constant 0 : index
    %c0_68 = arith.constant 0 : index
    %277 = vector.load %arg0[%276, %c0_67, %c0_68] : memref<16x8x512xf32, #tpu.memory_space<vmem>>, vector<1x8x512xf32>
    %278 = vector.shape_cast %277 : vector<1x8x512xf32> to vector<8x512xf32>
    %279 = arith.truncf %275 : vector<8x128xf32> to vector<8x128xbf16>
    %cst_69 = arith.constant dense<0.000000e+00> : vector<8x512xf32>
    %280 = tpu.matmul %279, %0, %cst_69 {dimension_numbers = #tpu.dot_dimension_numbers<[1], [0], [0], [1], [0, 0, 1, 1], [], []>} : vector<8x128xbf16>, vector<128x512xbf16>, vector<8x512xf32> -> vector<8x512xf32>
    %281 = arith.addf %278, %280 : vector<8x512xf32>
    %282 = math.tanh %281 : vector<8x512xf32>
    %283 = vector.extract_strided_slice %282 {offsets = [0, 0], sizes = [8, 384], strides = [1, 1]} : vector<8x512xf32> to vector<8x384xf32>
    %cst_70 = arith.constant 5.000000e-01 : f32
    %284 = vector.broadcast %cst_70 : f32 to vector<8x384xf32>
    %285 = arith.mulf %284, %283 : vector<8x384xf32>
    %cst_71 = arith.constant 5.000000e-01 : f32
    %286 = vector.broadcast %cst_71 : f32 to vector<8x384xf32>
    %287 = arith.addf %285, %286 : vector<8x384xf32>
    %288 = vector.extract_strided_slice %287 {offsets = [0, 0], sizes = [8, 128], strides = [1, 1]} : vector<8x384xf32> to vector<8x128xf32>
    %289 = vector.extract_strided_slice %287 {offsets = [0, 128], sizes = [8, 128], strides = [1, 1]} : vector<8x384xf32> to vector<8x128xf32>
    %290 = vector.extract_strided_slice %287 {offsets = [0, 256], sizes = [8, 128], strides = [1, 1]} : vector<8x384xf32> to vector<8x128xf32>
    %291 = vector.extract_strided_slice %282 {offsets = [0, 384], sizes = [8, 128], strides = [1, 1]} : vector<8x512xf32> to vector<8x128xf32>
    %292 = arith.mulf %289, %273 : vector<8x128xf32>
    %293 = arith.mulf %288, %291 : vector<8x128xf32>
    %294 = arith.addf %292, %293 : vector<8x128xf32>
    %295 = math.tanh %294 : vector<8x128xf32>
    %296 = arith.mulf %290, %295 : vector<8x128xf32>
    %c14_i32 = arith.constant 14 : i32
    %297 = arith.index_cast %c14_i32 : i32 to index
    %c0_72 = arith.constant 0 : index
    %c0_73 = arith.constant 0 : index
    %298 = vector.load %arg0[%297, %c0_72, %c0_73] : memref<16x8x512xf32, #tpu.memory_space<vmem>>, vector<1x8x512xf32>
    %299 = vector.shape_cast %298 : vector<1x8x512xf32> to vector<8x512xf32>
    %300 = arith.truncf %296 : vector<8x128xf32> to vector<8x128xbf16>
    %cst_74 = arith.constant dense<0.000000e+00> : vector<8x512xf32>
    %301 = tpu.matmul %300, %0, %cst_74 {dimension_numbers = #tpu.dot_dimension_numbers<[1], [0], [0], [1], [0, 0, 1, 1], [], []>} : vector<8x128xbf16>, vector<128x512xbf16>, vector<8x512xf32> -> vector<8x512xf32>
    %302 = arith.addf %299, %301 : vector<8x512xf32>
    %303 = math.tanh %302 : vector<8x512xf32>
    %304 = vector.extract_strided_slice %303 {offsets = [0, 0], sizes = [8, 384], strides = [1, 1]} : vector<8x512xf32> to vector<8x384xf32>
    %cst_75 = arith.constant 5.000000e-01 : f32
    %305 = vector.broadcast %cst_75 : f32 to vector<8x384xf32>
    %306 = arith.mulf %305, %304 : vector<8x384xf32>
    %cst_76 = arith.constant 5.000000e-01 : f32
    %307 = vector.broadcast %cst_76 : f32 to vector<8x384xf32>
    %308 = arith.addf %306, %307 : vector<8x384xf32>
    %309 = vector.extract_strided_slice %308 {offsets = [0, 0], sizes = [8, 128], strides = [1, 1]} : vector<8x384xf32> to vector<8x128xf32>
    %310 = vector.extract_strided_slice %308 {offsets = [0, 128], sizes = [8, 128], strides = [1, 1]} : vector<8x384xf32> to vector<8x128xf32>
    %311 = vector.extract_strided_slice %308 {offsets = [0, 256], sizes = [8, 128], strides = [1, 1]} : vector<8x384xf32> to vector<8x128xf32>
    %312 = vector.extract_strided_slice %303 {offsets = [0, 384], sizes = [8, 128], strides = [1, 1]} : vector<8x512xf32> to vector<8x128xf32>
    %313 = arith.mulf %310, %294 : vector<8x128xf32>
    %314 = arith.mulf %309, %312 : vector<8x128xf32>
    %315 = arith.addf %313, %314 : vector<8x128xf32>
    %316 = math.tanh %315 : vector<8x128xf32>
    %317 = arith.mulf %311, %316 : vector<8x128xf32>
    %c15_i32 = arith.constant 15 : i32
    %318 = arith.index_cast %c15_i32 : i32 to index
    %c0_77 = arith.constant 0 : index
    %c0_78 = arith.constant 0 : index
    %319 = vector.load %arg0[%318, %c0_77, %c0_78] : memref<16x8x512xf32, #tpu.memory_space<vmem>>, vector<1x8x512xf32>
    %320 = vector.shape_cast %319 : vector<1x8x512xf32> to vector<8x512xf32>
    %321 = arith.truncf %317 : vector<8x128xf32> to vector<8x128xbf16>
    %cst_79 = arith.constant dense<0.000000e+00> : vector<8x512xf32>
    %322 = tpu.matmul %321, %0, %cst_79 {dimension_numbers = #tpu.dot_dimension_numbers<[1], [0], [0], [1], [0, 0, 1, 1], [], []>} : vector<8x128xbf16>, vector<128x512xbf16>, vector<8x512xf32> -> vector<8x512xf32>
    %323 = arith.addf %320, %322 : vector<8x512xf32>
    %324 = math.tanh %323 : vector<8x512xf32>
    %325 = vector.extract_strided_slice %324 {offsets = [0, 0], sizes = [8, 384], strides = [1, 1]} : vector<8x512xf32> to vector<8x384xf32>
    %cst_80 = arith.constant 5.000000e-01 : f32
    %326 = vector.broadcast %cst_80 : f32 to vector<8x384xf32>
    %327 = arith.mulf %326, %325 : vector<8x384xf32>
    %cst_81 = arith.constant 5.000000e-01 : f32
    %328 = vector.broadcast %cst_81 : f32 to vector<8x384xf32>
    %329 = arith.addf %327, %328 : vector<8x384xf32>
    %330 = vector.extract_strided_slice %329 {offsets = [0, 0], sizes = [8, 128], strides = [1, 1]} : vector<8x384xf32> to vector<8x128xf32>
    %331 = vector.extract_strided_slice %329 {offsets = [0, 128], sizes = [8, 128], strides = [1, 1]} : vector<8x384xf32> to vector<8x128xf32>
    %332 = vector.extract_strided_slice %329 {offsets = [0, 256], sizes = [8, 128], strides = [1, 1]} : vector<8x384xf32> to vector<8x128xf32>
    %333 = vector.extract_strided_slice %324 {offsets = [0, 384], sizes = [8, 128], strides = [1, 1]} : vector<8x512xf32> to vector<8x128xf32>
    %334 = arith.mulf %331, %315 : vector<8x128xf32>
    %335 = arith.mulf %330, %333 : vector<8x128xf32>
    %336 = arith.addf %334, %335 : vector<8x128xf32>
    %337 = math.tanh %336 : vector<8x128xf32>
    %338 = arith.mulf %332, %337 : vector<8x128xf32>
    %c16_i32 = arith.constant 16 : i32
    %c0_82 = arith.constant 0 : index
    %c0_83 = arith.constant 0 : index
    %339 = vector.load %arg2[%c0_82, %c0_83] : memref<8x128xf32, #tpu.memory_space<vmem>>, vector<8x128xf32>
    tpu.vector_store %arg2[%c0_82, %c0_83], %338 {strides = array<i32>} : memref<8x128xf32, #tpu.memory_space<vmem>>, vector<8x128xf32>,
    return
  }
}

</mosaic_0001>

<bundles_post_ra>
// kernel: tpu_custom_call.1
= control target key start
LH: loop header
LB: loop body
LE: loop exit
PB: predicated region body
PF: predicated region fallthrough
CT: control target
= control target key end

     0   :  { %7 = vsyncpa [#allocation3], 0  ;;  %s3101_s0 = inlined_call_operand.hbm [shape: f32[16,8,512], index: 0, kind: input, shape index: {}]   ;;  %s3102_s1 = inlined_call_operand.hbm [shape: bf16[128,512], index: 1, kind: input, shape index: {}]   ;;  %s3103_s2 = inlined_call_operand.hbm [shape: f32[8,128], index: 2, kind: output, shape index: {}]  }
   0x1   :  { %8 = vsyncpa [#allocation6], 0 }
   0x2   :  { %9 = vsyncpa [#allocation4], 0  ;;  %s2324_s9 = smov [#allocation2]   ;;  %s2252_s13 = scalar_lea.hbm %s3101_s0, 8192 }
   0x3   :  { %s15_s10 = sshll.u32 %s2324_s9, 4  ;;  %p2253_p0 = scmp.ne.s32.totalorder %s3101_s0, %s2252_s13  ;;  %s16_s10 = int_to_ptr.vmem [resolvable:$true] %s15_s10 }
   0x4   :  { %p2256_p1 = scmp.lt.u32.totalorder %s2252_s13, %s3101_s0 }
   0x6   :  { %p2258_p2 = pnand %p2256_p1, %p2253_p0 }
   0x8   :  { %2261 = shalt.err (!%p2258_p2)
}
   0x9   :  { %s2262_s18 = scalar_lea.vmem %s16_s10, 8192  ;;  %p2267_p4 = scmp.lt.s32.totalorder %s16_s10, %s16_s10 }
   0xa   :  { %p2263_p3 = scmp.ne.s32.totalorder %s16_s10, %s2262_s18  ;;  %p2268_p5 = scmp.lt.s32.totalorder %s2262_s18, %s2262_s18 }
   0xc   :  { %p2269_p6 = por %p2268_p5, %p2267_p4 }
   0xe   :  { %p2270_p7 = pnand %p2269_p6, %p2263_p3 }
  0x10   :  { %2273 = shalt.err (!%p2270_p7)
}
  0x11   :  { %s2325_s19 = smov 512   ;;  %s2326_s20 = smov 32  }
  0x12   :  { %21 = dma.hbm_to_vmem [thread:$0]  %s3101_s0, 8192, %s16_s10, [#allocation3], %s2325_s19, %s2325_s19, %s2326_s20  }
  0x13   :  { %s2327_s23 = smov [#allocation5]   ;;  %s2274_s27 = scalar_lea.hbm %s3102_s1, 4096 }
  0x14   :  { %s27_s24 = sshll.u32 %s2327_s23, 4  ;;  %p2275_p8 = scmp.ne.s32.totalorder %s3102_s1, %s2274_s27  ;;  %s28_s24 = int_to_ptr.vmem [resolvable:$true] %s27_s24 }
  0x15   :  { %p2278_p9 = scmp.lt.u32.totalorder %s2274_s27, %s3102_s1 }
  0x17   :  { %p2280_p10 = pnand %p2278_p9, %p2275_p8 }
  0x19   :  { %2283 = shalt.err (!%p2280_p10)
}
  0x1a   :  { %s2284_s4 = scalar_lea.vmem %s28_s24, 4096  ;;  %p2289_p12 = scmp.lt.s32.totalorder %s28_s24, %s28_s24 }
  0x1b   :  { %p2285_p11 = scmp.ne.s32.totalorder %s28_s24, %s2284_s4  ;;  %p2290_p13 = scmp.lt.s32.totalorder %s2284_s4, %s2284_s4 }
  0x1d   :  { %p2291_p0 = por %p2290_p13, %p2289_p12 }
  0x1f   :  { %p2292_p1 = pnand %p2291_p0, %p2285_p11 }
  0x21   :  { %2295 = shalt.err (!%p2292_p1)
}
  0x22   :  { %s2328_s0 = smov 256   ;;  %s2329_s5 = smov 16  }
  0x23   :  { %33 = dma.hbm_to_vmem [thread:$0]  %s3102_s1, 4096, %s28_s24, [#allocation6], %s2328_s0, %s2328_s0, %s2329_s5  }
  0x24   :  { %2318 = dma.done.wait [#allocation3], 8192  }
  0x25   :  { %2319 = vsyncadd [#allocation3], 4294959104 }
  0x26   :  { %2320 = dma.done.wait [#allocation6], 4096  }
  0x27   :  { %2321 = vsyncadd [#allocation6], 4294963200  ;;  %v2330_v0 = vmov 0   ;;  %v2373_v1 = vld [vmem:[#allocation5 + $0x4] ss:$16 sps:$4 sm:$0xff]   ;;  %v74_v34 = vld [vmem:[#allocation2 + $0x8] sm:$0xff] }
  0x28   :  { %269 = vmatprep.mubr.bf16.mxu0 %v2330_v0  ;;  %310 = vmatprep.mubr.bf16.mxu1 %v2330_v0  ;;  %v2375_v2 = vld [vmem:[#allocation5] ss:$16 sps:$4 sm:$0xff]   ;;  %v2378_v3 = vld [vmem:[#allocation5 + $0xc] ss:$16 sps:$4 sm:$0xff]   ;;  %v2380_v4 = vld [vmem:[#allocation5 + $0x8] ss:$16 sps:$4 sm:$0xff]  }
  0x29   :  { %237 = vmatprep.subr.bf16.mxu0 %v2373_v1  ;;  %v2383_v5 = vld [vmem:[#allocation5 + $0x24] ss:$16 sps:$4 sm:$0xff]   ;;  %v2385_v6 = vld [vmem:[#allocation5 + $0x20] ss:$16 sps:$4 sm:$0xff]   ;;  %278 = vmatprep.subr.bf16.mxu1 %v2378_v3  ;;  %v2388_v7 = vld [vmem:[#allocation5 + $0x2c] ss:$16 sps:$4 sm:$0xff]  }
  0x2a   :  { %238 = vmatpush1.bf16.msra.mxu0 %v2375_v2  ;;  %279 = vmatpush1.bf16.msra.mxu1 %v2380_v4  ;;  %v2392_v8 = vld [vmem:[#allocation5 + $0x28] ss:$16 sps:$4 sm:$0xff]   ;;  %v2395_v9 = vld [vmem:[#allocation5 + $0x44] ss:$16 sps:$4 sm:$0xff]   ;;  %v2398_v10 = vld [vmem:[#allocation5 + $0x40] ss:$16 sps:$4 sm:$0xff]  }
  0x2b   :  { %239 = vmatprep.subr.bf16.mxu0 %v2383_v5  ;;  %280 = vmatprep.subr.bf16.mxu1 %v2388_v7  ;;  %v2400_v11 = vld [vmem:[#allocation5 + $0x4c] ss:$16 sps:$4 sm:$0xff]   ;;  %v2403_v12 = vld [vmem:[#allocation5 + $0x64] ss:$16 sps:$4 sm:$0xff]   ;;  %v2406_v13 = vld [vmem:[#allocation5 + $0x48] ss:$16 sps:$4 sm:$0xff]  }
  0x2c   :  { %v2409_v14 = vld [vmem:[#allocation5 + $0x6c] ss:$16 sps:$4 sm:$0xff]   ;;  %v2412_v15 = vld [vmem:[#allocation5 + $0x60] ss:$16 sps:$4 sm:$0xff]   ;;  %v2415_v16 = vld [vmem:[#allocation5 + $0x84] ss:$16 sps:$4 sm:$0xff]  }
  0x2d   :  { %v2418_v17 = vld [vmem:[#allocation5 + $0x68] ss:$16 sps:$4 sm:$0xff]   ;;  %v2421_v18 = vld [vmem:[#allocation5 + $0x8c] ss:$16 sps:$4 sm:$0xff]   ;;  %v2424_v19 = vld [vmem:[#allocation5 + $0x80] ss:$16 sps:$4 sm:$0xff]  }
  0x2e   :  { %240 = vmatpush1.bf16.msra.mxu0 %v2385_v6  ;;  %281 = vmatpush1.bf16.msra.mxu1 %v2392_v8  ;;  %v2427_v20 = vld [vmem:[#allocation5 + $0xa4] ss:$16 sps:$4 sm:$0xff]   ;;  %v2430_v21 = vld [vmem:[#allocation5 + $0x88] ss:$16 sps:$4 sm:$0xff]   ;;  %v2433_v22 = vld [vmem:[#allocation5 + $0xac] ss:$16 sps:$4 sm:$0xff]  }
  0x2f   :  { %241 = vmatprep.subr.bf16.mxu0 %v2395_v9  ;;  %282 = vmatprep.subr.bf16.mxu1 %v2400_v11  ;;  %v2436_v23 = vld [vmem:[#allocation5 + $0xa0] ss:$16 sps:$4 sm:$0xff]   ;;  %v2439_v24 = vld [vmem:[#allocation5 + $0xc4] ss:$16 sps:$4 sm:$0xff]   ;;  %v2442_v25 = vld [vmem:[#allocation5 + $0xa8] ss:$16 sps:$4 sm:$0xff]  }
  0x30   :  { %v2445_v26 = vld [vmem:[#allocation5 + $0xcc] ss:$16 sps:$4 sm:$0xff]   ;;  %v2448_v27 = vld [vmem:[#allocation5 + $0xc0] ss:$16 sps:$4 sm:$0xff]   ;;  %v2451_v28 = vld [vmem:[#allocation5 + $0xe4] ss:$16 sps:$4 sm:$0xff]  }
  0x31   :  { %v2454_v29 = vld [vmem:[#allocation5 + $0xc8] ss:$16 sps:$4 sm:$0xff]   ;;  %v2457_v30 = vld [vmem:[#allocation5 + $0xec] ss:$16 sps:$4 sm:$0xff]   ;;  %v2460_v31 = vld [vmem:[#allocation5 + $0xe0] ss:$16 sps:$4 sm:$0xff]  }
  0x32   :  { %242 = vmatpush1.bf16.msra.mxu0 %v2398_v10  ;;  %283 = vmatpush1.bf16.msra.mxu1 %v2406_v13  ;;  %v2464_v32 = vld [vmem:[#allocation5 + $0xe8] ss:$16 sps:$4 sm:$0xff]   ;;  %v73_v33 = vld [vmem:[#allocation2] sm:$0xff]  ;;  %v75_v47 = vld [vmem:[#allocation2 + $0x10] sm:$0xff]  ;;  %s2331_s1 = smov [#allocation7]  }
  0x33   :  { %243 = vmatprep.subr.bf16.mxu0 %v2403_v12  ;;  %284 = vmatprep.subr.bf16.mxu1 %v2409_v14  ;;  %v76_v38 = vld [vmem:[#allocation2 + $0x18] sm:$0xff]  ;;  %s1950_s8 = sshll.u32 %s2331_s1, 4  ;;  %s1951_s8 = int_to_ptr.vmem [resolvable:$true] %s1950_s8 }
  0x34   :  { %s2296_s9 = scalar_lea.vmem %s1951_s8, 128  ;;  %p2301_p3 = scmp.lt.s32.totalorder %s1951_s8, %s1951_s8 }
  0x35   :  { %p2297_p2 = scmp.ne.s32.totalorder %s1951_s8, %s2296_s9  ;;  %p2302_p4 = scmp.lt.s32.totalorder %s2296_s9, %s2296_s9 }
  0x36   :  { %244 = vmatpush1.bf16.msra.mxu0 %v2412_v15  ;;  %285 = vmatpush1.bf16.msra.mxu1 %v2418_v17 }
  0x37   :  { %245 = vmatprep.subr.bf16.mxu0 %v2415_v16  ;;  %286 = vmatprep.subr.bf16.mxu1 %v2421_v18  ;;  %p2303_p5 = por %p2302_p4, %p2301_p3 }
  0x39   :  { %p2304_p6 = pnand %p2303_p5, %p2297_p2 }
  0x3a   :  { %246 = vmatpush1.bf16.msra.mxu0 %v2424_v19  ;;  %287 = vmatpush1.bf16.msra.mxu1 %v2430_v21 }
  0x3b   :  { %247 = vmatprep.subr.bf16.mxu0 %v2427_v20  ;;  %288 = vmatprep.subr.bf16.mxu1 %v2433_v22 }
  0x3e   :  { %248 = vmatpush1.bf16.msra.mxu0 %v2436_v23  ;;  %289 = vmatpush1.bf16.msra.mxu1 %v2442_v25 }
  0x3f   :  { %249 = vmatprep.subr.bf16.mxu0 %v2439_v24  ;;  %290 = vmatprep.subr.bf16.mxu1 %v2445_v26 }
  0x42   :  { %250 = vmatpush1.bf16.msra.mxu0 %v2448_v27  ;;  %291 = vmatpush1.bf16.msra.mxu1 %v2454_v29 }
  0x43   :  { %251 = vmatprep.subr.bf16.mxu0 %v2451_v28  ;;  %292 = vmatprep.subr.bf16.mxu1 %v2457_v30 }
  0x46   :  { %252 = vmatpush1.bf16.msra.mxu0 %v2460_v31  ;;  %293 = vmatpush1.bf16.msra.mxu1 %v2464_v32 }
  0x47   :  { %344 = vmatprep.subr.bf16.mxu0 %v2373_v1  ;;  %385 = vmatprep.subr.bf16.mxu1 %v2378_v3 }
  0x49   :  { %270 = vmatmul.mubr.bf16.vlgmr.msra.gmra.mrb[0].mxu0 %v2330_v0  ;;  %311 = vmatmul.mubr.bf16.vlgmr.msra.gmra.mrb[0].mxu1 %v2330_v0 }
  0x4a   :  { %345 = vmatpush1.bf16.msra.mxu0 %v2375_v2  ;;  %376 = vmatprep.mubr.bf16.mxu0 %v2330_v0 }
  0x4b   :  { %346 = vmatprep.subr.bf16.mxu0 %v2383_v5  ;;  %386 = vmatpush1.bf16.msra.mxu1 %v2380_v4 }
  0x4c   :  { %417 = vmatprep.mubr.bf16.mxu1 %v2330_v0  ;;  %387 = vmatprep.subr.bf16.mxu1 %v2388_v7 }
  0x4e   :  { %347 = vmatpush1.bf16.msra.mxu0 %v2385_v6 }
  0x4f   :  { %348 = vmatprep.subr.bf16.mxu0 %v2395_v9  ;;  %388 = vmatpush1.bf16.msra.mxu1 %v2392_v8 }
  0x50   :  { %389 = vmatprep.subr.bf16.mxu1 %v2400_v11 }
  0x52   :  { %349 = vmatpush1.bf16.msra.mxu0 %v2398_v10 }
  0x53   :  { %350 = vmatprep.subr.bf16.mxu0 %v2403_v12  ;;  %390 = vmatpush1.bf16.msra.mxu1 %v2406_v13 }
  0x54   :  { %391 = vmatprep.subr.bf16.mxu1 %v2409_v14 }
  0x56   :  { %351 = vmatpush1.bf16.msra.mxu0 %v2412_v15 }
  0x57   :  { %352 = vmatprep.subr.bf16.mxu0 %v2415_v16  ;;  %392 = vmatpush1.bf16.msra.mxu1 %v2418_v17 }
  0x58   :  { %393 = vmatprep.subr.bf16.mxu1 %v2421_v18 }
  0x5a   :  { %353 = vmatpush1.bf16.msra.mxu0 %v2424_v19 }
  0x5b   :  { %354 = vmatprep.subr.bf16.mxu0 %v2427_v20  ;;  %394 = vmatpush1.bf16.msra.mxu1 %v2430_v21 }
  0x5c   :  { %395 = vmatprep.subr.bf16.mxu1 %v2433_v22 }
  0x5e   :  { %355 = vmatpush1.bf16.msra.mxu0 %v2436_v23 }
  0x5f   :  { %356 = vmatprep.subr.bf16.mxu0 %v2439_v24  ;;  %396 = vmatpush1.bf16.msra.mxu1 %v2442_v25 }
  0x60   :  { %397 = vmatprep.subr.bf16.mxu1 %v2445_v26 }
  0x62   :  { %357 = vmatpush1.bf16.msra.mxu0 %v2448_v27 }
  0x63   :  { %358 = vmatprep.subr.bf16.mxu0 %v2451_v28  ;;  %398 = vmatpush1.bf16.msra.mxu1 %v2454_v29 }
  0x64   :  { %399 = vmatprep.subr.bf16.mxu1 %v2457_v30 }
  0x66   :  { %359 = vmatpush1.bf16.msra.mxu0 %v2460_v31 }
  0x67   :  { %451 = vmatprep.subr.bf16.mxu0 %v2373_v1  ;;  %400 = vmatpush1.bf16.msra.mxu1 %v2464_v32 }
  0x68   :  { %492 = vmatprep.subr.bf16.mxu1 %v2378_v3 }
 0x11c   :  { %v271_v35 = vpop.f32.mrb[0].mxu0  ;;  %v312_v40 = vpop.f32.mrb[0].mxu1 }
 0x11d   :  { %v319_v36 = vadd.f32 %v271_v35, %v73_v33  ;;  %v273_v37 = vpop.f32.mrb[1].mxu0  ;;  %v314_v42 = vpop.f32.mrb[1].mxu1  ;;  %v321_v48 = vadd.f32 %v312_v40, %v75_v47  ;;  %v340_v35 = vld [vmem:[#allocation2 + $0x28] sm:$0xff] }
 0x11e   :  { %v320_v39 = vadd.f32 %v273_v37, %v74_v34  ;;  %v275_v41 = vpop.f32.mrb[2].mxu0  ;;  %v322_v44 = vadd.f32 %v314_v42, %v76_v38  ;;  %v316_v45 = vpop.f32.mrb[2].mxu1  ;;  %v339_v34 = vld [vmem:[#allocation2 + $0x20] sm:$0xff]  ;;  %v342_v38 = vld [vmem:[#allocation2 + $0x38] sm:$0xff] }
 0x11f   :  { %2048 = vtanh.f32 %v319_v36  ;;  %v276_v43 = vpop.f32.mrb[3].mxu0  ;;  %v317_v46 = vpop.f32.mrb[3].mxu1 }
 0x120   :  { %2050 = vtanh.f32 %v320_v39 }
 0x121   :  { %2052 = vtanh.f32 %v322_v44 }
 0x122   :  { %2054 = vtanh.f32 %v321_v48  ;;  %v341_v48 = vld [vmem:[#allocation2 + $0x30] sm:$0xff] }
 0x129   :  { %v2049_v49 = vpop.eup %2048 }
 0x12a   :  { %v2051_v50 = vpop.eup %2050  ;;  %v327_v51 = vmul.f32 0.5, %v2049_v49 }
 0x12b   :  { %v328_v52 = vmul.f32 0.5, %v2051_v50  ;;  %v2053_v53 = vpop.eup %2052 }
 0x12c   :  { %v330_v54 = vadd.f32 0.5, %v327_v51  ;;  %v2055_v59 = vpop.eup %2054 }
 0x12d   :  { %v331_v55 = vadd.f32 0.5, %v328_v52  ;;  %v329_v60 = vmul.f32 0.5, %v2055_v59 }
 0x12e   :  { %v334_v56 = vmul.f32 %v2053_v53, %v330_v54 }
 0x12f   :  { %v333_v57 = vmul.f32 0.0, %v331_v55  ;;  %v332_v61 = vadd.f32 0.5, %v329_v60 }
 0x131   :  { %v2507_v58 = vadd.f32 %v334_v56, %v333_v57 }
 0x133   :  { %2056 = vtanh.f32 %v2507_v58 }
 0x13d   :  { %v2057_v62 = vpop.eup %2056 }
 0x13e   :  { %v337_v63 = vmul.f32 %v2057_v62, %v332_v61 }
 0x140   :  { %v343_v33 = vpack.c.bf16 %v337_v63, %v337_v63 }
 0x142   :  { %377 = vmatmul.mubr.bf16.vlgmr.msra.gmra.mrb[4].mxu0 %v343_v33  ;;  %418 = vmatmul.mubr.bf16.vlgmr.msra.gmra.mrb[4].mxu1 %v343_v33 }
 0x143   :  { %452 = vmatpush1.bf16.msra.mxu0 %v2375_v2  ;;  %493 = vmatpush1.bf16.msra.mxu1 %v2380_v4 }
 0x144   :  { %453 = vmatprep.subr.bf16.mxu0 %v2383_v5  ;;  %494 = vmatprep.subr.bf16.mxu1 %v2388_v7 }
 0x145   :  { %483 = vmatprep.mubr.bf16.mxu0 %v2330_v0  ;;  %524 = vmatprep.mubr.bf16.mxu1 %v2330_v0 }
 0x147   :  { %454 = vmatpush1.bf16.msra.mxu0 %v2385_v6  ;;  %495 = vmatpush1.bf16.msra.mxu1 %v2392_v8 }
 0x148   :  { %455 = vmatprep.subr.bf16.mxu0 %v2395_v9  ;;  %496 = vmatprep.subr.bf16.mxu1 %v2400_v11 }
 0x14b   :  { %456 = vmatpush1.bf16.msra.mxu0 %v2398_v10  ;;  %497 = vmatpush1.bf16.msra.mxu1 %v2406_v13 }
 0x14c   :  { %457 = vmatprep.subr.bf16.mxu0 %v2403_v12  ;;  %498 = vmatprep.subr.bf16.mxu1 %v2409_v14 }
 0x14f   :  { %458 = vmatpush1.bf16.msra.mxu0 %v2412_v15  ;;  %499 = vmatpush1.bf16.msra.mxu1 %v2418_v17 }
 0x150   :  { %459 = vmatprep.subr.bf16.mxu0 %v2415_v16  ;;  %500 = vmatprep.subr.bf16.mxu1 %v2421_v18 }
 0x153   :  { %460 = vmatpush1.bf16.msra.mxu0 %v2424_v19  ;;  %501 = vmatpush1.bf16.msra.mxu1 %v2430_v21 }
 0x154   :  { %461 = vmatprep.subr.bf16.mxu0 %v2427_v20  ;;  %502 = vmatprep.subr.bf16.mxu1 %v2433_v22 }
 0x157   :  { %462 = vmatpush1.bf16.msra.mxu0 %v2436_v23  ;;  %503 = vmatpush1.bf16.msra.mxu1 %v2442_v25 }
 0x158   :  { %463 = vmatprep.subr.bf16.mxu0 %v2439_v24  ;;  %504 = vmatprep.subr.bf16.mxu1 %v2445_v26 }
 0x15b   :  { %464 = vmatpush1.bf16.msra.mxu0 %v2448_v27  ;;  %505 = vmatpush1.bf16.msra.mxu1 %v2454_v29 }
 0x15c   :  { %465 = vmatprep.subr.bf16.mxu0 %v2451_v28  ;;  %506 = vmatprep.subr.bf16.mxu1 %v2457_v30 }
 0x15f   :  { %466 = vmatpush1.bf16.msra.mxu0 %v2460_v31  ;;  %507 = vmatpush1.bf16.msra.mxu1 %v2464_v32 }
 0x160   :  { %558 = vmatprep.subr.bf16.mxu0 %v2373_v1  ;;  %599 = vmatprep.subr.bf16.mxu1 %v2378_v3 }
 0x215   :  { %v378_v36 = vpop.f32.mrb[4].mxu0  ;;  %v419_v37 = vpop.f32.mrb[4].mxu1 }
 0x216   :  { %v426_v39 = vadd.f32 %v378_v36, %v339_v34  ;;  %v380_v40 = vpop.f32.mrb[5].mxu0  ;;  %v421_v41 = vpop.f32.mrb[5].mxu1  ;;  %v428_v49 = vadd.f32 %v419_v37, %v341_v48  ;;  %v447_v36 = vld [vmem:[#allocation2 + $0x48] sm:$0xff] }
 0x217   :  { %v427_v42 = vadd.f32 %v380_v40, %v340_v35  ;;  %v382_v43 = vpop.f32.mrb[6].mxu0  ;;  %v423_v44 = vpop.f32.mrb[6].mxu1  ;;  %v429_v45 = vadd.f32 %v421_v41, %v342_v38 }
 0x218   :  { %2058 = vtanh.f32 %v426_v39  ;;  %v383_v46 = vpop.f32.mrb[7].mxu0  ;;  %v424_v47 = vpop.f32.mrb[7].mxu1  ;;  %v449_v39 = vld [vmem:[#allocation2 + $0x58] sm:$0xff] }
 0x219   :  { %2060 = vtanh.f32 %v427_v42 }
 0x21a   :  { %2062 = vtanh.f32 %v429_v45 }
 0x21b   :  { %2064 = vtanh.f32 %v428_v49  ;;  %v448_v49 = vld [vmem:[#allocation2 + $0x50] sm:$0xff] }
 0x222   :  { %v2059_v50 = vpop.eup %2058 }
 0x223   :  { %v434_v51 = vmul.f32 0.5, %v2059_v50  ;;  %v2061_v52 = vpop.eup %2060 }
 0x224   :  { %v435_v54 = vmul.f32 0.5, %v2061_v52  ;;  %v2063_v55 = vpop.eup %2062 }
 0x225   :  { %v437_v53 = vadd.f32 0.5, %v434_v51  ;;  %v2065_v61 = vpop.eup %2064 }
 0x226   :  { %v438_v56 = vadd.f32 0.5, %v435_v54  ;;  %v436_v62 = vmul.f32 0.5, %v2065_v61 }
 0x227   :  { %v441_v57 = vmul.f32 %v2063_v55, %v437_v53 }
 0x228   :  { %v440_v59 = vmul.f32 %v438_v56, %v2507_v58  ;;  %v439_v63 = vadd.f32 0.5, %v436_v62  ;;  %v446_v58 = vld [vmem:[#allocation2 + $0x40] sm:$0xff] }
 0x22a   :  { %v2545_v60 = vadd.f32 %v441_v57, %v440_v59 }
 0x22c   :  { %2066 = vtanh.f32 %v2545_v60 }
 0x236   :  { %v2067_v33 = vpop.eup %2066 }
 0x237   :  { %v444_v34 = vmul.f32 %v2067_v33, %v439_v63 }
 0x239   :  { %v450_v35 = vpack.c.bf16 %v444_v34, %v444_v34 }
 0x23b   :  { %484 = vmatmul.mubr.bf16.vlgmr.msra.gmra.mrb[8].mxu0 %v450_v35  ;;  %525 = vmatmul.mubr.bf16.vlgmr.msra.gmra.mrb[8].mxu1 %v450_v35 }
 0x23c   :  { %559 = vmatpush1.bf16.msra.mxu0 %v2375_v2  ;;  %600 = vmatpush1.bf16.msra.mxu1 %v2380_v4 }
 0x23d   :  { %560 = vmatprep.subr.bf16.mxu0 %v2383_v5  ;;  %601 = vmatprep.subr.bf16.mxu1 %v2388_v7 }
 0x23e   :  { %590 = vmatprep.mubr.bf16.mxu0 %v2330_v0  ;;  %631 = vmatprep.mubr.bf16.mxu1 %v2330_v0 }
 0x240   :  { %561 = vmatpush1.bf16.msra.mxu0 %v2385_v6  ;;  %602 = vmatpush1.bf16.msra.mxu1 %v2392_v8 }
 0x241   :  { %562 = vmatprep.subr.bf16.mxu0 %v2395_v9  ;;  %603 = vmatprep.subr.bf16.mxu1 %v2400_v11 }
 0x244   :  { %563 = vmatpush1.bf16.msra.mxu0 %v2398_v10  ;;  %604 = vmatpush1.bf16.msra.mxu1 %v2406_v13 }
 0x245   :  { %564 = vmatprep.subr.bf16.mxu0 %v2403_v12  ;;  %605 = vmatprep.subr.bf16.mxu1 %v2409_v14 }
 0x248   :  { %565 = vmatpush1.bf16.msra.mxu0 %v2412_v15  ;;  %606 = vmatpush1.bf16.msra.mxu1 %v2418_v17 }
 0x249   :  { %566 = vmatprep.subr.bf16.mxu0 %v2415_v16  ;;  %607 = vmatprep.subr.bf16.mxu1 %v2421_v18 }
 0x24c   :  { %567 = vmatpush1.bf16.msra.mxu0 %v2424_v19  ;;  %608 = vmatpush1.bf16.msra.mxu1 %v2430_v21 }
 0x24d   :  { %568 = vmatprep.subr.bf16.mxu0 %v2427_v20  ;;  %609 = vmatprep.subr.bf16.mxu1 %v2433_v22 }
 0x250   :  { %569 = vmatpush1.bf16.msra.mxu0 %v2436_v23  ;;  %610 = vmatpush1.bf16.msra.mxu1 %v2442_v25 }
 0x251   :  { %570 = vmatprep.subr.bf16.mxu0 %v2439_v24  ;;  %611 = vmatprep.subr.bf16.mxu1 %v2445_v26 }
 0x254   :  { %571 = vmatpush1.bf16.msra.mxu0 %v2448_v27  ;;  %612 = vmatpush1.bf16.msra.mxu1 %v2454_v29 }
 0x255   :  { %572 = vmatprep.subr.bf16.mxu0 %v2451_v28  ;;  %613 = vmatprep.subr.bf16.mxu1 %v2457_v30 }
 0x258   :  { %573 = vmatpush1.bf16.msra.mxu0 %v2460_v31  ;;  %614 = vmatpush1.bf16.msra.mxu1 %v2464_v32 }
 0x259   :  { %665 = vmatprep.subr.bf16.mxu0 %v2373_v1  ;;  %706 = vmatprep.subr.bf16.mxu1 %v2378_v3 }
 0x30e   :  { %v485_v37 = vpop.f32.mrb[8].mxu0  ;;  %v526_v38 = vpop.f32.mrb[8].mxu1 }
 0x30f   :  { %v533_v40 = vadd.f32 %v485_v37, %v446_v58  ;;  %v487_v41 = vpop.f32.mrb[9].mxu0  ;;  %v528_v42 = vpop.f32.mrb[9].mxu1  ;;  %v535_v50 = vadd.f32 %v526_v38, %v448_v49  ;;  %v554_v37 = vld [vmem:[#allocation2 + $0x68] sm:$0xff] }
 0x310   :  { %v534_v43 = vadd.f32 %v487_v41, %v447_v36  ;;  %v489_v44 = vpop.f32.mrb[10].mxu0  ;;  %v530_v45 = vpop.f32.mrb[10].mxu1  ;;  %v536_v46 = vadd.f32 %v528_v42, %v449_v39 }
 0x311   :  { %2068 = vtanh.f32 %v533_v40  ;;  %v490_v47 = vpop.f32.mrb[11].mxu0  ;;  %v531_v48 = vpop.f32.mrb[11].mxu1  ;;  %v556_v40 = vld [vmem:[#allocation2 + $0x78] sm:$0xff] }
 0x312   :  { %2070 = vtanh.f32 %v534_v43 }
 0x313   :  { %2072 = vtanh.f32 %v536_v46 }
 0x314   :  { %2074 = vtanh.f32 %v535_v50  ;;  %v555_v50 = vld [vmem:[#allocation2 + $0x70] sm:$0xff] }
 0x31b   :  { %v2069_v51 = vpop.eup %2068 }
 0x31c   :  { %v541_v52 = vmul.f32 0.5, %v2069_v51  ;;  %v2071_v53 = vpop.eup %2070 }
 0x31d   :  { %v542_v55 = vmul.f32 0.5, %v2071_v53  ;;  %v2073_v56 = vpop.eup %2072 }
 0x31e   :  { %v544_v54 = vadd.f32 0.5, %v541_v52  ;;  %v2075_v63 = vpop.eup %2074 }
 0x31f   :  { %v545_v57 = vadd.f32 0.5, %v542_v55  ;;  %v543_v33 = vmul.f32 0.5, %v2075_v63 }
 0x320   :  { %v548_v59 = vmul.f32 %v2073_v56, %v544_v54 }
 0x321   :  { %v547_v61 = vmul.f32 %v545_v57, %v2545_v60  ;;  %v546_v34 = vadd.f32 0.5, %v543_v33  ;;  %v553_v60 = vld [vmem:[#allocation2 + $0x60] sm:$0xff] }
 0x323   :  { %v2583_v62 = vadd.f32 %v548_v59, %v547_v61 }
 0x325   :  { %2076 = vtanh.f32 %v2583_v62 }
 0x32f   :  { %v2077_v35 = vpop.eup %2076 }
 0x330   :  { %v551_v58 = vmul.f32 %v2077_v35, %v546_v34 }
 0x332   :  { %v557_v36 = vpack.c.bf16 %v551_v58, %v551_v58 }
 0x334   :  { %591 = vmatmul.mubr.bf16.vlgmr.msra.gmra.mrb[12].mxu0 %v557_v36  ;;  %632 = vmatmul.mubr.bf16.vlgmr.msra.gmra.mrb[12].mxu1 %v557_v36 }
 0x335   :  { %666 = vmatpush1.bf16.msra.mxu0 %v2375_v2  ;;  %707 = vmatpush1.bf16.msra.mxu1 %v2380_v4 }
 0x336   :  { %667 = vmatprep.subr.bf16.mxu0 %v2383_v5  ;;  %708 = vmatprep.subr.bf16.mxu1 %v2388_v7 }
 0x337   :  { %697 = vmatprep.mubr.bf16.mxu0 %v2330_v0  ;;  %738 = vmatprep.mubr.bf16.mxu1 %v2330_v0 }
 0x339   :  { %668 = vmatpush1.bf16.msra.mxu0 %v2385_v6  ;;  %709 = vmatpush1.bf16.msra.mxu1 %v2392_v8 }
 0x33a   :  { %669 = vmatprep.subr.bf16.mxu0 %v2395_v9  ;;  %710 = vmatprep.subr.bf16.mxu1 %v2400_v11 }
 0x33d   :  { %670 = vmatpush1.bf16.msra.mxu0 %v2398_v10  ;;  %711 = vmatpush1.bf16.msra.mxu1 %v2406_v13 }
 0x33e   :  { %671 = vmatprep.subr.bf16.mxu0 %v2403_v12  ;;  %712 = vmatprep.subr.bf16.mxu1 %v2409_v14 }
 0x341   :  { %672 = vmatpush1.bf16.msra.mxu0 %v2412_v15  ;;  %713 = vmatpush1.bf16.msra.mxu1 %v2418_v17 }
 0x342   :  { %673 = vmatprep.subr.bf16.mxu0 %v2415_v16  ;;  %714 = vmatprep.subr.bf16.mxu1 %v2421_v18 }
 0x345   :  { %674 = vmatpush1.bf16.msra.mxu0 %v2424_v19  ;;  %715 = vmatpush1.bf16.msra.mxu1 %v2430_v21 }
 0x346   :  { %675 = vmatprep.subr.bf16.mxu0 %v2427_v20  ;;  %716 = vmatprep.subr.bf16.mxu1 %v2433_v22 }
 0x349   :  { %676 = vmatpush1.bf16.msra.mxu0 %v2436_v23  ;;  %717 = vmatpush1.bf16.msra.mxu1 %v2442_v25 }
 0x34a   :  { %677 = vmatprep.subr.bf16.mxu0 %v2439_v24  ;;  %718 = vmatprep.subr.bf16.mxu1 %v2445_v26 }
 0x34d   :  { %678 = vmatpush1.bf16.msra.mxu0 %v2448_v27  ;;  %719 = vmatpush1.bf16.msra.mxu1 %v2454_v29 }
 0x34e   :  { %679 = vmatprep.subr.bf16.mxu0 %v2451_v28  ;;  %720 = vmatprep.subr.bf16.mxu1 %v2457_v30 }
 0x351   :  { %680 = vmatpush1.bf16.msra.mxu0 %v2460_v31  ;;  %721 = vmatpush1.bf16.msra.mxu1 %v2464_v32 }
 0x352   :  { %772 = vmatprep.subr.bf16.mxu0 %v2373_v1  ;;  %813 = vmatprep.subr.bf16.mxu1 %v2378_v3 }
 0x407   :  { %v592_v38 = vpop.f32.mrb[12].mxu0  ;;  %v633_v39 = vpop.f32.mrb[12].mxu1 }
 0x408   :  { %v640_v41 = vadd.f32 %v592_v38, %v553_v60  ;;  %v594_v42 = vpop.f32.mrb[13].mxu0  ;;  %v635_v43 = vpop.f32.mrb[13].mxu1  ;;  %v642_v51 = vadd.f32 %v633_v39, %v555_v50  ;;  %v661_v38 = vld [vmem:[#allocation2 + $0x88] sm:$0xff] }
 0x409   :  { %v641_v44 = vadd.f32 %v594_v42, %v554_v37  ;;  %v596_v45 = vpop.f32.mrb[14].mxu0  ;;  %v637_v46 = vpop.f32.mrb[14].mxu1  ;;  %v643_v47 = vadd.f32 %v635_v43, %v556_v40 }
 0x40a   :  { %2078 = vtanh.f32 %v640_v41  ;;  %v597_v48 = vpop.f32.mrb[15].mxu0  ;;  %v638_v49 = vpop.f32.mrb[15].mxu1  ;;  %v663_v41 = vld [vmem:[#allocation2 + $0x98] sm:$0xff] }
 0x40b   :  { %2080 = vtanh.f32 %v641_v44 }
 0x40c   :  { %2082 = vtanh.f32 %v643_v47 }
 0x40d   :  { %2084 = vtanh.f32 %v642_v51  ;;  %v662_v51 = vld [vmem:[#allocation2 + $0x90] sm:$0xff] }
 0x414   :  { %v2079_v52 = vpop.eup %2078 }
 0x415   :  { %v648_v53 = vmul.f32 0.5, %v2079_v52  ;;  %v2081_v54 = vpop.eup %2080 }
 0x416   :  { %v649_v56 = vmul.f32 0.5, %v2081_v54  ;;  %v2083_v57 = vpop.eup %2082 }
 0x417   :  { %v651_v55 = vadd.f32 0.5, %v648_v53  ;;  %v2085_v34 = vpop.eup %2084 }
 0x418   :  { %v652_v59 = vadd.f32 0.5, %v649_v56  ;;  %v650_v35 = vmul.f32 0.5, %v2085_v34 }
 0x419   :  { %v655_v61 = vmul.f32 %v2083_v57, %v651_v55 }
 0x41a   :  { %v654_v63 = vmul.f32 %v652_v59, %v2583_v62  ;;  %v653_v58 = vadd.f32 0.5, %v650_v35  ;;  %v660_v62 = vld [vmem:[#allocation2 + $0x80] sm:$0xff] }
 0x41c   :  { %v2621_v33 = vadd.f32 %v655_v61, %v654_v63 }
 0x41e   :  { %2086 = vtanh.f32 %v2621_v33 }
 0x428   :  { %v2087_v36 = vpop.eup %2086 }
 0x429   :  { %v658_v60 = vmul.f32 %v2087_v36, %v653_v58 }
 0x42b   :  { %v664_v37 = vpack.c.bf16 %v658_v60, %v658_v60 }
 0x42d   :  { %698 = vmatmul.mubr.bf16.vlgmr.msra.gmra.mrb[16].mxu0 %v664_v37  ;;  %739 = vmatmul.mubr.bf16.vlgmr.msra.gmra.mrb[16].mxu1 %v664_v37 }
 0x42e   :  { %773 = vmatpush1.bf16.msra.mxu0 %v2375_v2  ;;  %814 = vmatpush1.bf16.msra.mxu1 %v2380_v4 }
 0x42f   :  { %774 = vmatprep.subr.bf16.mxu0 %v2383_v5  ;;  %815 = vmatprep.subr.bf16.mxu1 %v2388_v7 }
 0x430   :  { %804 = vmatprep.mubr.bf16.mxu0 %v2330_v0  ;;  %845 = vmatprep.mubr.bf16.mxu1 %v2330_v0 }
 0x432   :  { %775 = vmatpush1.bf16.msra.mxu0 %v2385_v6  ;;  %816 = vmatpush1.bf16.msra.mxu1 %v2392_v8 }
 0x433   :  { %776 = vmatprep.subr.bf16.mxu0 %v2395_v9  ;;  %817 = vmatprep.subr.bf16.mxu1 %v2400_v11 }
 0x436   :  { %777 = vmatpush1.bf16.msra.mxu0 %v2398_v10  ;;  %818 = vmatpush1.bf16.msra.mxu1 %v2406_v13 }
 0x437   :  { %778 = vmatprep.subr.bf16.mxu0 %v2403_v12  ;;  %819 = vmatprep.subr.bf16.mxu1 %v2409_v14 }
 0x43a   :  { %779 = vmatpush1.bf16.msra.mxu0 %v2412_v15  ;;  %820 = vmatpush1.bf16.msra.mxu1 %v2418_v17 }
 0x43b   :  { %780 = vmatprep.subr.bf16.mxu0 %v2415_v16  ;;  %821 = vmatprep.subr.bf16.mxu1 %v2421_v18 }
 0x43e   :  { %781 = vmatpush1.bf16.msra.mxu0 %v2424_v19  ;;  %822 = vmatpush1.bf16.msra.mxu1 %v2430_v21 }
 0x43f   :  { %782 = vmatprep.subr.bf16.mxu0 %v2427_v20  ;;  %823 = vmatprep.subr.bf16.mxu1 %v2433_v22 }
 0x442   :  { %783 = vmatpush1.bf16.msra.mxu0 %v2436_v23  ;;  %824 = vmatpush1.bf16.msra.mxu1 %v2442_v25 }
 0x443   :  { %784 = vmatprep.subr.bf16.mxu0 %v2439_v24  ;;  %825 = vmatprep.subr.bf16.mxu1 %v2445_v26 }
 0x446   :  { %785 = vmatpush1.bf16.msra.mxu0 %v2448_v27  ;;  %826 = vmatpush1.bf16.msra.mxu1 %v2454_v29 }
 0x447   :  { %786 = vmatprep.subr.bf16.mxu0 %v2451_v28  ;;  %827 = vmatprep.subr.bf16.mxu1 %v2457_v30 }
 0x44a   :  { %787 = vmatpush1.bf16.msra.mxu0 %v2460_v31  ;;  %828 = vmatpush1.bf16.msra.mxu1 %v2464_v32 }
 0x44b   :  { %879 = vmatprep.subr.bf16.mxu0 %v2373_v1  ;;  %920 = vmatprep.subr.bf16.mxu1 %v2378_v3 }
 0x500   :  { %v699_v39 = vpop.f32.mrb[16].mxu0  ;;  %v740_v40 = vpop.f32.mrb[16].mxu1 }
 0x501   :  { %v747_v42 = vadd.f32 %v699_v39, %v660_v62  ;;  %v701_v43 = vpop.f32.mrb[17].mxu0  ;;  %v742_v44 = vpop.f32.mrb[17].mxu1  ;;  %v749_v52 = vadd.f32 %v740_v40, %v662_v51 }
 0x502   :  { %v748_v45 = vadd.f32 %v701_v43, %v661_v38  ;;  %v703_v46 = vpop.f32.mrb[18].mxu0  ;;  %v744_v47 = vpop.f32.mrb[18].mxu1  ;;  %v750_v48 = vadd.f32 %v742_v44, %v663_v41 }
 0x503   :  { %2088 = vtanh.f32 %v747_v42  ;;  %v704_v49 = vpop.f32.mrb[19].mxu0  ;;  %v745_v50 = vpop.f32.mrb[19].mxu1 }
 0x504   :  { %2090 = vtanh.f32 %v748_v45 }
 0x505   :  { %2092 = vtanh.f32 %v750_v48 }
 0x506   :  { %2094 = vtanh.f32 %v749_v52 }
 0x50d   :  { %v2089_v53 = vpop.eup %2088 }
 0x50e   :  { %v755_v54 = vmul.f32 0.5, %v2089_v53  ;;  %v2091_v55 = vpop.eup %2090 }
 0x50f   :  { %v756_v57 = vmul.f32 0.5, %v2091_v55  ;;  %v2093_v59 = vpop.eup %2092 }
 0x510   :  { %v758_v56 = vadd.f32 0.5, %v755_v54  ;;  %v2095_v58 = vpop.eup %2094 }
 0x511   :  { %v759_v61 = vadd.f32 0.5, %v756_v57  ;;  %v757_v36 = vmul.f32 0.5, %v2095_v58  ;;  %v2703_v57 = vld [vmem:[#allocation5 + $0x8] ss:$16 sps:$4 sm:$0xff]   ;;  %v2723_v58 = vld [vmem:[#allocation5 + $0x4c] ss:$16 sps:$4 sm:$0xff]  }
 0x512   :  { %v762_v63 = vmul.f32 %v2093_v59, %v758_v56  ;;  %v2700_v56 = vld [vmem:[#allocation5] ss:$16 sps:$4 sm:$0xff]   ;;  %v2706_v59 = vld [vmem:[#allocation5 + $0x24] ss:$16 sps:$4 sm:$0xff]  }
 0x513   :  { %v761_v34 = vmul.f32 %v759_v61, %v2621_v33  ;;  %v760_v60 = vadd.f32 0.5, %v757_v36  ;;  %v2709_v61 = vld [vmem:[#allocation5 + $0x2c] ss:$16 sps:$4 sm:$0xff]   ;;  %v2726_v36 = vld [vmem:[#allocation5 + $0x40] ss:$16 sps:$4 sm:$0xff]  }
 0x515   :  { %v2659_v35 = vadd.f32 %v762_v63, %v761_v34  ;;  %v2714_v63 = vld [vmem:[#allocation5 + $0x20] ss:$16 sps:$4 sm:$0xff]   ;;  %v2717_v34 = vld [vmem:[#allocation5 + $0x28] ss:$16 sps:$4 sm:$0xff]  }
 0x517   :  { %2096 = vtanh.f32 %v2659_v35 }
 0x521   :  { %v2097_v37 = vpop.eup %2096 }
 0x522   :  { %v765_v62 = vmul.f32 %v2097_v37, %v760_v60  ;;  %v2729_v60 = vld [vmem:[#allocation5 + $0x48] ss:$16 sps:$4 sm:$0xff]   ;;  %v2732_v37 = vld [vmem:[#allocation5 + $0x64] ss:$16 sps:$4 sm:$0xff]  }
 0x524   :  { %v771_v38 = vpack.c.bf16 %v765_v62, %v765_v62  ;;  %v2735_v62 = vld [vmem:[#allocation5 + $0x6c] ss:$16 sps:$4 sm:$0xff]  }
 0x526   :  { %805 = vmatmul.mubr.bf16.vlgmr.msra.gmra.mrb[20].mxu0 %v771_v38  ;;  %846 = vmatmul.mubr.bf16.vlgmr.msra.gmra.mrb[20].mxu1 %v771_v38 }
 0x527   :  { %880 = vmatpush1.bf16.msra.mxu0 %v2375_v2  ;;  %921 = vmatpush1.bf16.msra.mxu1 %v2380_v4  ;;  %v767_v2 = vld [vmem:[#allocation2 + $0xa0] sm:$0xff]  ;;  %v768_v4 = vld [vmem:[#allocation2 + $0xa8] sm:$0xff] }
 0x528   :  { %881 = vmatprep.subr.bf16.mxu0 %v2383_v5  ;;  %922 = vmatprep.subr.bf16.mxu1 %v2388_v7  ;;  %v770_v7 = vld [vmem:[#allocation2 + $0xb8] sm:$0xff] }
 0x529   :  { %911 = vmatprep.mubr.bf16.mxu0 %v2330_v0  ;;  %952 = vmatprep.mubr.bf16.mxu1 %v2330_v0 }
 0x52b   :  { %882 = vmatpush1.bf16.msra.mxu0 %v2385_v6  ;;  %923 = vmatpush1.bf16.msra.mxu1 %v2392_v8 }
 0x52c   :  { %883 = vmatprep.subr.bf16.mxu0 %v2395_v9  ;;  %924 = vmatprep.subr.bf16.mxu1 %v2400_v11 }
 0x52f   :  { %884 = vmatpush1.bf16.msra.mxu0 %v2398_v10  ;;  %925 = vmatpush1.bf16.msra.mxu1 %v2406_v13 }
 0x530   :  { %885 = vmatprep.subr.bf16.mxu0 %v2403_v12  ;;  %926 = vmatprep.subr.bf16.mxu1 %v2409_v14 }
 0x533   :  { %886 = vmatpush1.bf16.msra.mxu0 %v2412_v15  ;;  %927 = vmatpush1.bf16.msra.mxu1 %v2418_v17 }
 0x534   :  { %887 = vmatprep.subr.bf16.mxu0 %v2415_v16  ;;  %928 = vmatprep.subr.bf16.mxu1 %v2421_v18 }
 0x537   :  { %888 = vmatpush1.bf16.msra.mxu0 %v2424_v19  ;;  %929 = vmatpush1.bf16.msra.mxu1 %v2430_v21 }
 0x538   :  { %889 = vmatprep.subr.bf16.mxu0 %v2427_v20  ;;  %930 = vmatprep.subr.bf16.mxu1 %v2433_v22 }
 0x53b   :  { %890 = vmatpush1.bf16.msra.mxu0 %v2436_v23  ;;  %931 = vmatpush1.bf16.msra.mxu1 %v2442_v25 }
 0x53c   :  { %891 = vmatprep.subr.bf16.mxu0 %v2439_v24  ;;  %932 = vmatprep.subr.bf16.mxu1 %v2445_v26 }
 0x53f   :  { %892 = vmatpush1.bf16.msra.mxu0 %v2448_v27  ;;  %933 = vmatpush1.bf16.msra.mxu1 %v2454_v29 }
 0x540   :  { %893 = vmatprep.subr.bf16.mxu0 %v2451_v28  ;;  %934 = vmatprep.subr.bf16.mxu1 %v2457_v30 }
 0x543   :  { %894 = vmatpush1.bf16.msra.mxu0 %v2460_v31  ;;  %935 = vmatpush1.bf16.msra.mxu1 %v2464_v32 }
 0x544   :  { %986 = vmatprep.subr.bf16.mxu0 %v2373_v1  ;;  %1027 = vmatprep.subr.bf16.mxu1 %v2378_v3  ;;  %v769_v1 = vld [vmem:[#allocation2 + $0xb0] sm:$0xff] }
 0x5f9   :  { %v806_v5 = vpop.f32.mrb[20].mxu0  ;;  %v847_v6 = vpop.f32.mrb[20].mxu1 }
 0x5fa   :  { %v854_v8 = vadd.f32 %v806_v5, %v767_v2  ;;  %v808_v9 = vpop.f32.mrb[21].mxu0  ;;  %v849_v10 = vpop.f32.mrb[21].mxu1  ;;  %v856_v40 = vadd.f32 %v847_v6, %v769_v1 }
 0x5fb   :  { %v855_v11 = vadd.f32 %v808_v9, %v768_v4  ;;  %v810_v12 = vpop.f32.mrb[22].mxu0  ;;  %v851_v13 = vpop.f32.mrb[22].mxu1  ;;  %v857_v14 = vadd.f32 %v849_v10, %v770_v7 }
 0x5fc   :  { %2098 = vtanh.f32 %v854_v8  ;;  %v811_v33 = vpop.f32.mrb[23].mxu0  ;;  %v852_v39 = vpop.f32.mrb[23].mxu1 }
 0x5fd   :  { %2100 = vtanh.f32 %v855_v11 }
 0x5fe   :  { %2102 = vtanh.f32 %v857_v14 }
 0x5ff   :  { %2104 = vtanh.f32 %v856_v40  ;;  %v2780_v40 = vld [vmem:[#allocation5 + $0x60] ss:$16 sps:$4 sm:$0xff]  }
 0x606   :  { %v2099_v3 = vpop.eup %2098 }
 0x607   :  { %v862_v41 = vmul.f32 0.5, %v2099_v3  ;;  %v2101_v42 = vpop.eup %2100  ;;  %v2783_v3 = vld [vmem:[#allocation5 + $0x68] ss:$16 sps:$4 sm:$0xff]  }
 0x608   :  { %v863_v44 = vmul.f32 0.5, %v2101_v42  ;;  %v2103_v45 = vpop.eup %2102  ;;  %v2789_v42 = vld [vmem:[#allocation5 + $0x8c] ss:$16 sps:$4 sm:$0xff]  }
 0x609   :  { %v865_v43 = vadd.f32 0.5, %v862_v41  ;;  %v2105_v50 = vpop.eup %2104  ;;  %v2786_v41 = vld [vmem:[#allocation5 + $0x84] ss:$16 sps:$4 sm:$0xff]  }
 0x60a   :  { %v866_v46 = vadd.f32 0.5, %v863_v44  ;;  %v864_v51 = vmul.f32 0.5, %v2105_v50  ;;  %v2795_v44 = vld [vmem:[#allocation5 + $0x88] ss:$16 sps:$4 sm:$0xff]   ;;  %v2813_v50 = vld [vmem:[#allocation5 + $0xcc] ss:$16 sps:$4 sm:$0xff]  }
 0x60b   :  { %v869_v47 = vmul.f32 %v2103_v45, %v865_v43  ;;  %v2792_v43 = vld [vmem:[#allocation5 + $0x80] ss:$16 sps:$4 sm:$0xff]   ;;  %v2798_v45 = vld [vmem:[#allocation5 + $0xa4] ss:$16 sps:$4 sm:$0xff]  }
 0x60c   :  { %v868_v48 = vmul.f32 %v866_v46, %v2659_v35  ;;  %v867_v52 = vadd.f32 0.5, %v864_v51  ;;  %v2720_v35 = vld [vmem:[#allocation5 + $0x44] ss:$16 sps:$4 sm:$0xff]   ;;  %v2801_v46 = vld [vmem:[#allocation5 + $0xac] ss:$16 sps:$4 sm:$0xff]  }
 0x60d   :  { %v2816_v51 = vld [vmem:[#allocation5 + $0xc0] ss:$16 sps:$4 sm:$0xff]  }
 0x60e   :  { %v2697_v49 = vadd.f32 %v869_v47, %v868_v48  ;;  %v2804_v47 = vld [vmem:[#allocation5 + $0xa0] ss:$16 sps:$4 sm:$0xff]   ;;  %v2807_v48 = vld [vmem:[#allocation5 + $0xa8] ss:$16 sps:$4 sm:$0xff]  }
 0x610   :  { %2106 = vtanh.f32 %v2697_v49 }
 0x61a   :  { %v2107_v53 = vpop.eup %2106 }
 0x61b   :  { %v872_v54 = vmul.f32 %v2107_v53, %v867_v52  ;;  %v2819_v52 = vld [vmem:[#allocation5 + $0xc8] ss:$16 sps:$4 sm:$0xff]   ;;  %v2822_v53 = vld [vmem:[#allocation5 + $0xe4] ss:$16 sps:$4 sm:$0xff]  }
 0x61d   :  { %v878_v55 = vpack.c.bf16 %v872_v54, %v872_v54  ;;  %v2825_v54 = vld [vmem:[#allocation5 + $0xec] ss:$16 sps:$4 sm:$0xff]  }
 0x61f   :  { %912 = vmatmul.mubr.bf16.vlgmr.msra.gmra.mrb[24].mxu0 %v878_v55  ;;  %953 = vmatmul.mubr.bf16.vlgmr.msra.gmra.mrb[24].mxu1 %v878_v55  ;;  %v2828_v55 = vld [vmem:[#allocation5 + $0xe0] ss:$16 sps:$4 sm:$0xff]  }
 0x620   :  { %987 = vmatpush1.bf16.msra.mxu0 %v2700_v56  ;;  %1028 = vmatpush1.bf16.msra.mxu1 %v2703_v57 }
 0x621   :  { %988 = vmatprep.subr.bf16.mxu0 %v2706_v59  ;;  %1029 = vmatprep.subr.bf16.mxu1 %v2709_v61 }
 0x622   :  { %1018 = vmatprep.mubr.bf16.mxu0 %v2330_v0  ;;  %1059 = vmatprep.mubr.bf16.mxu1 %v2330_v0 }
 0x624   :  { %989 = vmatpush1.bf16.msra.mxu0 %v2714_v63  ;;  %1030 = vmatpush1.bf16.msra.mxu1 %v2717_v34 }
 0x625   :  { %990 = vmatprep.subr.bf16.mxu0 %v2720_v35  ;;  %1031 = vmatprep.subr.bf16.mxu1 %v2723_v58 }
 0x628   :  { %991 = vmatpush1.bf16.msra.mxu0 %v2726_v36  ;;  %1032 = vmatpush1.bf16.msra.mxu1 %v2729_v60 }
 0x629   :  { %992 = vmatprep.subr.bf16.mxu0 %v2732_v37  ;;  %1033 = vmatprep.subr.bf16.mxu1 %v2735_v62 }
 0x62c   :  { %993 = vmatpush1.bf16.msra.mxu0 %v2412_v15  ;;  %1034 = vmatpush1.bf16.msra.mxu1 %v2418_v17  ;;  %v2756_v15 = vld [vmem:[#allocation5 + $0x4] ss:$16 sps:$4 sm:$0xff]  }
 0x62d   :  { %994 = vmatprep.subr.bf16.mxu0 %v2415_v16  ;;  %1035 = vmatprep.subr.bf16.mxu1 %v2421_v18  ;;  %v2759_v16 = vld [vmem:[#allocation5 + $0xc] ss:$16 sps:$4 sm:$0xff]   ;;  %v874_v17 = vld [vmem:[#allocation2 + $0xc0] sm:$0xff] }
 0x62e   :  { %v875_v18 = vld [vmem:[#allocation2 + $0xc8] sm:$0xff] }
 0x630   :  { %995 = vmatpush1.bf16.msra.mxu0 %v2424_v19  ;;  %1036 = vmatpush1.bf16.msra.mxu1 %v2430_v21  ;;  %v877_v21 = vld [vmem:[#allocation2 + $0xd8] sm:$0xff] }
 0x631   :  { %996 = vmatprep.subr.bf16.mxu0 %v2427_v20  ;;  %1037 = vmatprep.subr.bf16.mxu1 %v2433_v22 }
 0x634   :  { %997 = vmatpush1.bf16.msra.mxu0 %v2436_v23  ;;  %1038 = vmatpush1.bf16.msra.mxu1 %v2442_v25 }
 0x635   :  { %998 = vmatprep.subr.bf16.mxu0 %v2439_v24  ;;  %1039 = vmatprep.subr.bf16.mxu1 %v2445_v26 }
 0x638   :  { %999 = vmatpush1.bf16.msra.mxu0 %v2448_v27  ;;  %1040 = vmatpush1.bf16.msra.mxu1 %v2454_v29 }
 0x639   :  { %1000 = vmatprep.subr.bf16.mxu0 %v2451_v28  ;;  %1041 = vmatprep.subr.bf16.mxu1 %v2457_v30 }
 0x63c   :  { %1001 = vmatpush1.bf16.msra.mxu0 %v2460_v31  ;;  %1042 = vmatpush1.bf16.msra.mxu1 %v2464_v32  ;;  %v876_v31 = vld [vmem:[#allocation2 + $0xd0] sm:$0xff] }
 0x63d   :  { %1093 = vmatprep.subr.bf16.mxu0 %v2756_v15  ;;  %1134 = vmatprep.subr.bf16.mxu1 %v2759_v16 }
 0x6f2   :  { %v913_v19 = vpop.f32.mrb[24].mxu0  ;;  %v954_v20 = vpop.f32.mrb[24].mxu1 }
 0x6f3   :  { %v961_v22 = vadd.f32 %v913_v19, %v874_v17  ;;  %v915_v23 = vpop.f32.mrb[25].mxu0  ;;  %v956_v24 = vpop.f32.mrb[25].mxu1  ;;  %v963_v32 = vadd.f32 %v954_v20, %v876_v31  ;;  %v2831_v17 = vld [vmem:[#allocation5 + $0xe8] ss:$16 sps:$4 sm:$0xff]  }
 0x6f4   :  { %v962_v25 = vadd.f32 %v915_v23, %v875_v18  ;;  %v917_v26 = vpop.f32.mrb[26].mxu0  ;;  %v958_v27 = vpop.f32.mrb[26].mxu1  ;;  %v964_v28 = vadd.f32 %v956_v24, %v877_v21  ;;  %v981_v18 = vld [vmem:[#allocation2 + $0xe0] sm:$0xff]  ;;  %v982_v19 = vld [vmem:[#allocation2 + $0xe8] sm:$0xff] }
 0x6f5   :  { %2108 = vtanh.f32 %v961_v22  ;;  %v918_v29 = vpop.f32.mrb[27].mxu0  ;;  %v959_v30 = vpop.f32.mrb[27].mxu1  ;;  %v984_v22 = vld [vmem:[#allocation2 + $0xf8] sm:$0xff] }
 0x6f6   :  { %2110 = vtanh.f32 %v962_v25 }
 0x6f7   :  { %2112 = vtanh.f32 %v964_v28 }
 0x6f8   :  { %2114 = vtanh.f32 %v963_v32  ;;  %v983_v32 = vld [vmem:[#allocation2 + $0xf0] sm:$0xff] }
 0x6ff   :  { %v2109_v38 = vpop.eup %2108 }
 0x700   :  { %v969_v2 = vmul.f32 0.5, %v2109_v38  ;;  %v2111_v4 = vpop.eup %2110 }
 0x701   :  { %v970_v6 = vmul.f32 0.5, %v2111_v4  ;;  %v2113_v7 = vpop.eup %2112 }
 0x702   :  { %v972_v5 = vadd.f32 0.5, %v969_v2  ;;  %v2115_v12 = vpop.eup %2114 }
 0x703   :  { %v973_v8 = vadd.f32 0.5, %v970_v6  ;;  %v971_v13 = vmul.f32 0.5, %v2115_v12 }
 0x704   :  { %v976_v9 = vmul.f32 %v2113_v7, %v972_v5 }
 0x705   :  { %v975_v10 = vmul.f32 %v973_v8, %v2697_v49  ;;  %v974_v14 = vadd.f32 0.5, %v971_v13  ;;  %v2810_v49 = vld [vmem:[#allocation5 + $0xc4] ss:$16 sps:$4 sm:$0xff]  }
 0x707   :  { %v2763_v11 = vadd.f32 %v976_v9, %v975_v10 }
 0x709   :  { %2116 = vtanh.f32 %v2763_v11 }
 0x713   :  { %v2117_v33 = vpop.eup %2116 }
 0x714   :  { %v979_v39 = vmul.f32 %v2117_v33, %v974_v14 }
 0x716   :  { %v985_v1 = vpack.c.bf16 %v979_v39, %v979_v39 }
 0x718   :  { %1019 = vmatmul.mubr.bf16.vlgmr.msra.gmra.mrb[28].mxu0 %v985_v1  ;;  %1060 = vmatmul.mubr.bf16.vlgmr.msra.gmra.mrb[28].mxu1 %v985_v1 }
 0x719   :  { %1094 = vmatpush1.bf16.msra.mxu0 %v2700_v56  ;;  %1135 = vmatpush1.bf16.msra.mxu1 %v2703_v57 }
 0x71a   :  { %1095 = vmatprep.subr.bf16.mxu0 %v2706_v59  ;;  %1136 = vmatprep.subr.bf16.mxu1 %v2709_v61 }
 0x71b   :  { %1125 = vmatprep.mubr.bf16.mxu0 %v2330_v0  ;;  %1166 = vmatprep.mubr.bf16.mxu1 %v2330_v0 }
 0x71d   :  { %1096 = vmatpush1.bf16.msra.mxu0 %v2714_v63  ;;  %1137 = vmatpush1.bf16.msra.mxu1 %v2717_v34 }
 0x71e   :  { %1097 = vmatprep.subr.bf16.mxu0 %v2720_v35  ;;  %1138 = vmatprep.subr.bf16.mxu1 %v2723_v58 }
 0x721   :  { %1098 = vmatpush1.bf16.msra.mxu0 %v2726_v36  ;;  %1139 = vmatpush1.bf16.msra.mxu1 %v2729_v60 }
 0x722   :  { %1099 = vmatprep.subr.bf16.mxu0 %v2732_v37  ;;  %1140 = vmatprep.subr.bf16.mxu1 %v2735_v62 }
 0x725   :  { %1100 = vmatpush1.bf16.msra.mxu0 %v2780_v40  ;;  %1141 = vmatpush1.bf16.msra.mxu1 %v2783_v3 }
 0x726   :  { %1101 = vmatprep.subr.bf16.mxu0 %v2786_v41  ;;  %1142 = vmatprep.subr.bf16.mxu1 %v2789_v42 }
 0x729   :  { %1102 = vmatpush1.bf16.msra.mxu0 %v2792_v43  ;;  %1143 = vmatpush1.bf16.msra.mxu1 %v2795_v44 }
 0x72a   :  { %1103 = vmatprep.subr.bf16.mxu0 %v2798_v45  ;;  %1144 = vmatprep.subr.bf16.mxu1 %v2801_v46 }
 0x72d   :  { %1104 = vmatpush1.bf16.msra.mxu0 %v2804_v47  ;;  %1145 = vmatpush1.bf16.msra.mxu1 %v2807_v48 }
 0x72e   :  { %1105 = vmatprep.subr.bf16.mxu0 %v2810_v49  ;;  %1146 = vmatprep.subr.bf16.mxu1 %v2813_v50 }
 0x731   :  { %1106 = vmatpush1.bf16.msra.mxu0 %v2816_v51  ;;  %1147 = vmatpush1.bf16.msra.mxu1 %v2819_v52 }
 0x732   :  { %1107 = vmatprep.subr.bf16.mxu0 %v2822_v53  ;;  %1148 = vmatprep.subr.bf16.mxu1 %v2825_v54 }
 0x735   :  { %1108 = vmatpush1.bf16.msra.mxu0 %v2828_v55  ;;  %1149 = vmatpush1.bf16.msra.mxu1 %v2831_v17 }
 0x736   :  { %1200 = vmatprep.subr.bf16.mxu0 %v2756_v15  ;;  %1241 = vmatprep.subr.bf16.mxu1 %v2759_v16 }
 0x7eb   :  { %v1020_v20 = vpop.f32.mrb[28].mxu0  ;;  %v1061_v21 = vpop.f32.mrb[28].mxu1 }
 0x7ec   :  { %v1068_v23 = vadd.f32 %v1020_v20, %v981_v18  ;;  %v1022_v24 = vpop.f32.mrb[29].mxu0  ;;  %v1063_v25 = vpop.f32.mrb[29].mxu1  ;;  %v1070_v38 = vadd.f32 %v1061_v21, %v983_v32  ;;  %v1089_v20 = vld [vmem:[#allocation2 + $0x108] sm:$0xff] }
 0x7ed   :  { %v1069_v26 = vadd.f32 %v1022_v24, %v982_v19  ;;  %v1024_v27 = vpop.f32.mrb[30].mxu0  ;;  %v1065_v28 = vpop.f32.mrb[30].mxu1  ;;  %v1071_v29 = vadd.f32 %v1063_v25, %v984_v22 }
 0x7ee   :  { %2118 = vtanh.f32 %v1068_v23  ;;  %v1025_v30 = vpop.f32.mrb[31].mxu0  ;;  %v1066_v31 = vpop.f32.mrb[31].mxu1  ;;  %v1091_v23 = vld [vmem:[#allocation2 + $0x118] sm:$0xff] }
 0x7ef   :  { %2120 = vtanh.f32 %v1069_v26 }
 0x7f0   :  { %2122 = vtanh.f32 %v1071_v29 }
 0x7f1   :  { %2124 = vtanh.f32 %v1070_v38  ;;  %v1090_v38 = vld [vmem:[#allocation2 + $0x110] sm:$0xff] }
 0x7f8   :  { %v2119_v2 = vpop.eup %2118 }
 0x7f9   :  { %v1076_v4 = vmul.f32 0.5, %v2119_v2  ;;  %v2121_v5 = vpop.eup %2120 }
 0x7fa   :  { %v1077_v7 = vmul.f32 0.5, %v2121_v5  ;;  %v2123_v8 = vpop.eup %2122 }
 0x7fb   :  { %v1079_v6 = vadd.f32 0.5, %v1076_v4  ;;  %v2125_v14 = vpop.eup %2124 }
 0x7fc   :  { %v1080_v9 = vadd.f32 0.5, %v1077_v7  ;;  %v1078_v33 = vmul.f32 0.5, %v2125_v14 }
 0x7fd   :  { %v1083_v10 = vmul.f32 %v2123_v8, %v1079_v6 }
 0x7fe   :  { %v1082_v12 = vmul.f32 %v1080_v9, %v2763_v11  ;;  %v1081_v39 = vadd.f32 0.5, %v1078_v33  ;;  %v1088_v11 = vld [vmem:[#allocation2 + $0x100] sm:$0xff] }
 0x800   :  { %v2837_v13 = vadd.f32 %v1083_v10, %v1082_v12 }
 0x802   :  { %2126 = vtanh.f32 %v2837_v13 }
 0x80c   :  { %v2127_v1 = vpop.eup %2126 }
 0x80d   :  { %v1086_v18 = vmul.f32 %v2127_v1, %v1081_v39 }
 0x80f   :  { %v1092_v19 = vpack.c.bf16 %v1086_v18, %v1086_v18 }
 0x811   :  { %1126 = vmatmul.mubr.bf16.vlgmr.msra.gmra.mrb[32].mxu0 %v1092_v19  ;;  %1167 = vmatmul.mubr.bf16.vlgmr.msra.gmra.mrb[32].mxu1 %v1092_v19 }
 0x812   :  { %1201 = vmatpush1.bf16.msra.mxu0 %v2700_v56  ;;  %1242 = vmatpush1.bf16.msra.mxu1 %v2703_v57 }
 0x813   :  { %1202 = vmatprep.subr.bf16.mxu0 %v2706_v59  ;;  %1243 = vmatprep.subr.bf16.mxu1 %v2709_v61 }
 0x814   :  { %1232 = vmatprep.mubr.bf16.mxu0 %v2330_v0  ;;  %1273 = vmatprep.mubr.bf16.mxu1 %v2330_v0 }
 0x816   :  { %1203 = vmatpush1.bf16.msra.mxu0 %v2714_v63  ;;  %1244 = vmatpush1.bf16.msra.mxu1 %v2717_v34 }
 0x817   :  { %1204 = vmatprep.subr.bf16.mxu0 %v2720_v35  ;;  %1245 = vmatprep.subr.bf16.mxu1 %v2723_v58 }
 0x81a   :  { %1205 = vmatpush1.bf16.msra.mxu0 %v2726_v36  ;;  %1246 = vmatpush1.bf16.msra.mxu1 %v2729_v60 }
 0x81b   :  { %1206 = vmatprep.subr.bf16.mxu0 %v2732_v37  ;;  %1247 = vmatprep.subr.bf16.mxu1 %v2735_v62 }
 0x81e   :  { %1207 = vmatpush1.bf16.msra.mxu0 %v2780_v40  ;;  %1248 = vmatpush1.bf16.msra.mxu1 %v2783_v3 }
 0x81f   :  { %1208 = vmatprep.subr.bf16.mxu0 %v2786_v41  ;;  %1249 = vmatprep.subr.bf16.mxu1 %v2789_v42 }
 0x822   :  { %1209 = vmatpush1.bf16.msra.mxu0 %v2792_v43  ;;  %1250 = vmatpush1.bf16.msra.mxu1 %v2795_v44 }
 0x823   :  { %1210 = vmatprep.subr.bf16.mxu0 %v2798_v45  ;;  %1251 = vmatprep.subr.bf16.mxu1 %v2801_v46 }
 0x826   :  { %1211 = vmatpush1.bf16.msra.mxu0 %v2804_v47  ;;  %1252 = vmatpush1.bf16.msra.mxu1 %v2807_v48 }
 0x827   :  { %1212 = vmatprep.subr.bf16.mxu0 %v2810_v49  ;;  %1253 = vmatprep.subr.bf16.mxu1 %v2813_v50 }
 0x82a   :  { %1213 = vmatpush1.bf16.msra.mxu0 %v2816_v51  ;;  %1254 = vmatpush1.bf16.msra.mxu1 %v2819_v52 }
 0x82b   :  { %1214 = vmatprep.subr.bf16.mxu0 %v2822_v53  ;;  %1255 = vmatprep.subr.bf16.mxu1 %v2825_v54 }
 0x82e   :  { %1215 = vmatpush1.bf16.msra.mxu0 %v2828_v55  ;;  %1256 = vmatpush1.bf16.msra.mxu1 %v2831_v17 }
 0x82f   :  { %1307 = vmatprep.subr.bf16.mxu0 %v2756_v15  ;;  %1348 = vmatprep.subr.bf16.mxu1 %v2759_v16 }
 0x8e4   :  { %v1127_v21 = vpop.f32.mrb[32].mxu0  ;;  %v1168_v22 = vpop.f32.mrb[32].mxu1 }
 0x8e5   :  { %v1175_v24 = vadd.f32 %v1127_v21, %v1088_v11  ;;  %v1129_v25 = vpop.f32.mrb[33].mxu0  ;;  %v1170_v26 = vpop.f32.mrb[33].mxu1  ;;  %v1177_v2 = vadd.f32 %v1168_v22, %v1090_v38  ;;  %v1196_v21 = vld [vmem:[#allocation2 + $0x128] sm:$0xff] }
 0x8e6   :  { %v1176_v27 = vadd.f32 %v1129_v25, %v1089_v20  ;;  %v1131_v28 = vpop.f32.mrb[34].mxu0  ;;  %v1172_v29 = vpop.f32.mrb[34].mxu1  ;;  %v1178_v30 = vadd.f32 %v1170_v26, %v1091_v23 }
 0x8e7   :  { %2128 = vtanh.f32 %v1175_v24  ;;  %v1132_v31 = vpop.f32.mrb[35].mxu0  ;;  %v1173_v32 = vpop.f32.mrb[35].mxu1  ;;  %v1198_v24 = vld [vmem:[#allocation2 + $0x138] sm:$0xff] }
 0x8e8   :  { %2130 = vtanh.f32 %v1176_v27 }
 0x8e9   :  { %2132 = vtanh.f32 %v1178_v30 }
 0x8ea   :  { %2134 = vtanh.f32 %v1177_v2  ;;  %v1197_v2 = vld [vmem:[#allocation2 + $0x130] sm:$0xff] }
 0x8f1   :  { %v2129_v4 = vpop.eup %2128 }
 0x8f2   :  { %v1183_v5 = vmul.f32 0.5, %v2129_v4  ;;  %v2131_v6 = vpop.eup %2130 }
 0x8f3   :  { %v1184_v8 = vmul.f32 0.5, %v2131_v6  ;;  %v2133_v9 = vpop.eup %2132 }
 0x8f4   :  { %v1186_v7 = vadd.f32 0.5, %v1183_v5  ;;  %v2135_v39 = vpop.eup %2134 }
 0x8f5   :  { %v1187_v10 = vadd.f32 0.5, %v1184_v8  ;;  %v1185_v1 = vmul.f32 0.5, %v2135_v39 }
 0x8f6   :  { %v1190_v12 = vmul.f32 %v2133_v9, %v1186_v7 }
 0x8f7   :  { %v1189_v14 = vmul.f32 %v1187_v10, %v2837_v13  ;;  %v1188_v18 = vadd.f32 0.5, %v1185_v1  ;;  %v1195_v13 = vld [vmem:[#allocation2 + $0x120] sm:$0xff] }
 0x8f9   :  { %v2875_v33 = vadd.f32 %v1190_v12, %v1189_v14 }
 0x8fb   :  { %2136 = vtanh.f32 %v2875_v33 }
 0x905   :  { %v2137_v19 = vpop.eup %2136 }
 0x906   :  { %v1193_v11 = vmul.f32 %v2137_v19, %v1188_v18 }
 0x908   :  { %v1199_v20 = vpack.c.bf16 %v1193_v11, %v1193_v11 }
 0x90a   :  { %1233 = vmatmul.mubr.bf16.vlgmr.msra.gmra.mrb[36].mxu0 %v1199_v20  ;;  %1274 = vmatmul.mubr.bf16.vlgmr.msra.gmra.mrb[36].mxu1 %v1199_v20 }
 0x90b   :  { %1308 = vmatpush1.bf16.msra.mxu0 %v2700_v56  ;;  %1349 = vmatpush1.bf16.msra.mxu1 %v2703_v57 }
 0x90c   :  { %1309 = vmatprep.subr.bf16.mxu0 %v2706_v59  ;;  %1350 = vmatprep.subr.bf16.mxu1 %v2709_v61 }
 0x90d   :  { %1339 = vmatprep.mubr.bf16.mxu0 %v2330_v0  ;;  %1380 = vmatprep.mubr.bf16.mxu1 %v2330_v0 }
 0x90f   :  { %1310 = vmatpush1.bf16.msra.mxu0 %v2714_v63  ;;  %1351 = vmatpush1.bf16.msra.mxu1 %v2717_v34 }
 0x910   :  { %1311 = vmatprep.subr.bf16.mxu0 %v2720_v35  ;;  %1352 = vmatprep.subr.bf16.mxu1 %v2723_v58 }
 0x913   :  { %1312 = vmatpush1.bf16.msra.mxu0 %v2726_v36  ;;  %1353 = vmatpush1.bf16.msra.mxu1 %v2729_v60 }
 0x914   :  { %1313 = vmatprep.subr.bf16.mxu0 %v2732_v37  ;;  %1354 = vmatprep.subr.bf16.mxu1 %v2735_v62 }
 0x917   :  { %1314 = vmatpush1.bf16.msra.mxu0 %v2780_v40  ;;  %1355 = vmatpush1.bf16.msra.mxu1 %v2783_v3 }
 0x918   :  { %1315 = vmatprep.subr.bf16.mxu0 %v2786_v41  ;;  %1356 = vmatprep.subr.bf16.mxu1 %v2789_v42 }
 0x91b   :  { %1316 = vmatpush1.bf16.msra.mxu0 %v2792_v43  ;;  %1357 = vmatpush1.bf16.msra.mxu1 %v2795_v44 }
 0x91c   :  { %1317 = vmatprep.subr.bf16.mxu0 %v2798_v45  ;;  %1358 = vmatprep.subr.bf16.mxu1 %v2801_v46 }
 0x91f   :  { %1318 = vmatpush1.bf16.msra.mxu0 %v2804_v47  ;;  %1359 = vmatpush1.bf16.msra.mxu1 %v2807_v48 }
 0x920   :  { %1319 = vmatprep.subr.bf16.mxu0 %v2810_v49  ;;  %1360 = vmatprep.subr.bf16.mxu1 %v2813_v50 }
 0x923   :  { %1320 = vmatpush1.bf16.msra.mxu0 %v2816_v51  ;;  %1361 = vmatpush1.bf16.msra.mxu1 %v2819_v52 }
 0x924   :  { %1321 = vmatprep.subr.bf16.mxu0 %v2822_v53  ;;  %1362 = vmatprep.subr.bf16.mxu1 %v2825_v54 }
 0x927   :  { %1322 = vmatpush1.bf16.msra.mxu0 %v2828_v55  ;;  %1363 = vmatpush1.bf16.msra.mxu1 %v2831_v17 }
 0x928   :  { %1414 = vmatprep.subr.bf16.mxu0 %v2756_v15  ;;  %1455 = vmatprep.subr.bf16.mxu1 %v2759_v16 }
 0x9dd   :  { %v1234_v22 = vpop.f32.mrb[36].mxu0  ;;  %v1275_v23 = vpop.f32.mrb[36].mxu1 }
 0x9de   :  { %v1282_v25 = vadd.f32 %v1234_v22, %v1195_v13  ;;  %v1236_v26 = vpop.f32.mrb[37].mxu0  ;;  %v1277_v27 = vpop.f32.mrb[37].mxu1  ;;  %v1284_v4 = vadd.f32 %v1275_v23, %v1197_v2  ;;  %v1303_v22 = vld [vmem:[#allocation2 + $0x148] sm:$0xff] }
 0x9df   :  { %v1283_v28 = vadd.f32 %v1236_v26, %v1196_v21  ;;  %v1238_v29 = vpop.f32.mrb[38].mxu0  ;;  %v1279_v30 = vpop.f32.mrb[38].mxu1  ;;  %v1285_v31 = vadd.f32 %v1277_v27, %v1198_v24 }
 0x9e0   :  { %2138 = vtanh.f32 %v1282_v25  ;;  %v1239_v32 = vpop.f32.mrb[39].mxu0  ;;  %v1280_v38 = vpop.f32.mrb[39].mxu1  ;;  %v1305_v25 = vld [vmem:[#allocation2 + $0x158] sm:$0xff] }
 0x9e1   :  { %2140 = vtanh.f32 %v1283_v28 }
 0x9e2   :  { %2142 = vtanh.f32 %v1285_v31 }
 0x9e3   :  { %2144 = vtanh.f32 %v1284_v4  ;;  %v1304_v4 = vld [vmem:[#allocation2 + $0x150] sm:$0xff] }
 0x9ea   :  { %v2139_v5 = vpop.eup %2138 }
 0x9eb   :  { %v1290_v6 = vmul.f32 0.5, %v2139_v5  ;;  %v2141_v7 = vpop.eup %2140 }
 0x9ec   :  { %v1291_v9 = vmul.f32 0.5, %v2141_v7  ;;  %v2143_v10 = vpop.eup %2142 }
 0x9ed   :  { %v1293_v8 = vadd.f32 0.5, %v1290_v6  ;;  %v2145_v18 = vpop.eup %2144 }
 0x9ee   :  { %v1294_v12 = vadd.f32 0.5, %v1291_v9  ;;  %v1292_v19 = vmul.f32 0.5, %v2145_v18 }
 0x9ef   :  { %v1297_v14 = vmul.f32 %v2143_v10, %v1293_v8 }
 0x9f0   :  { %v1296_v39 = vmul.f32 %v1294_v12, %v2875_v33  ;;  %v1295_v11 = vadd.f32 0.5, %v1292_v19  ;;  %v1302_v33 = vld [vmem:[#allocation2 + $0x140] sm:$0xff] }
 0x9f2   :  { %v2913_v1 = vadd.f32 %v1297_v14, %v1296_v39 }
 0x9f4   :  { %2146 = vtanh.f32 %v2913_v1 }
 0x9fe   :  { %v2147_v20 = vpop.eup %2146 }
 0x9ff   :  { %v1300_v13 = vmul.f32 %v2147_v20, %v1295_v11 }
 0xa01   :  { %v1306_v21 = vpack.c.bf16 %v1300_v13, %v1300_v13 }
 0xa03   :  { %1340 = vmatmul.mubr.bf16.vlgmr.msra.gmra.mrb[40].mxu0 %v1306_v21  ;;  %1381 = vmatmul.mubr.bf16.vlgmr.msra.gmra.mrb[40].mxu1 %v1306_v21 }
 0xa04   :  { %1415 = vmatpush1.bf16.msra.mxu0 %v2700_v56  ;;  %1456 = vmatpush1.bf16.msra.mxu1 %v2703_v57 }
 0xa05   :  { %1416 = vmatprep.subr.bf16.mxu0 %v2706_v59  ;;  %1457 = vmatprep.subr.bf16.mxu1 %v2709_v61 }
 0xa06   :  { %1446 = vmatprep.mubr.bf16.mxu0 %v2330_v0  ;;  %1487 = vmatprep.mubr.bf16.mxu1 %v2330_v0 }
 0xa08   :  { %1417 = vmatpush1.bf16.msra.mxu0 %v2714_v63  ;;  %1458 = vmatpush1.bf16.msra.mxu1 %v2717_v34 }
 0xa09   :  { %1418 = vmatprep.subr.bf16.mxu0 %v2720_v35  ;;  %1459 = vmatprep.subr.bf16.mxu1 %v2723_v58 }
 0xa0c   :  { %1419 = vmatpush1.bf16.msra.mxu0 %v2726_v36  ;;  %1460 = vmatpush1.bf16.msra.mxu1 %v2729_v60 }
 0xa0d   :  { %1420 = vmatprep.subr.bf16.mxu0 %v2732_v37  ;;  %1461 = vmatprep.subr.bf16.mxu1 %v2735_v62 }
 0xa10   :  { %1421 = vmatpush1.bf16.msra.mxu0 %v2780_v40  ;;  %1462 = vmatpush1.bf16.msra.mxu1 %v2783_v3 }
 0xa11   :  { %1422 = vmatprep.subr.bf16.mxu0 %v2786_v41  ;;  %1463 = vmatprep.subr.bf16.mxu1 %v2789_v42 }
 0xa14   :  { %1423 = vmatpush1.bf16.msra.mxu0 %v2792_v43  ;;  %1464 = vmatpush1.bf16.msra.mxu1 %v2795_v44 }
 0xa15   :  { %1424 = vmatprep.subr.bf16.mxu0 %v2798_v45  ;;  %1465 = vmatprep.subr.bf16.mxu1 %v2801_v46 }
 0xa18   :  { %1425 = vmatpush1.bf16.msra.mxu0 %v2804_v47  ;;  %1466 = vmatpush1.bf16.msra.mxu1 %v2807_v48 }
 0xa19   :  { %1426 = vmatprep.subr.bf16.mxu0 %v2810_v49  ;;  %1467 = vmatprep.subr.bf16.mxu1 %v2813_v50 }
 0xa1c   :  { %1427 = vmatpush1.bf16.msra.mxu0 %v2816_v51  ;;  %1468 = vmatpush1.bf16.msra.mxu1 %v2819_v52 }
 0xa1d   :  { %1428 = vmatprep.subr.bf16.mxu0 %v2822_v53  ;;  %1469 = vmatprep.subr.bf16.mxu1 %v2825_v54 }
 0xa20   :  { %1429 = vmatpush1.bf16.msra.mxu0 %v2828_v55  ;;  %1470 = vmatpush1.bf16.msra.mxu1 %v2831_v17 }
 0xa21   :  { %1521 = vmatprep.subr.bf16.mxu0 %v2756_v15  ;;  %1562 = vmatprep.subr.bf16.mxu1 %v2759_v16 }
 0xad6   :  { %v1341_v23 = vpop.f32.mrb[40].mxu0  ;;  %v1382_v24 = vpop.f32.mrb[40].mxu1 }
 0xad7   :  { %v1389_v26 = vadd.f32 %v1341_v23, %v1302_v33  ;;  %v1343_v27 = vpop.f32.mrb[41].mxu0  ;;  %v1384_v28 = vpop.f32.mrb[41].mxu1  ;;  %v1391_v5 = vadd.f32 %v1382_v24, %v1304_v4  ;;  %v1410_v23 = vld [vmem:[#allocation2 + $0x168] sm:$0xff] }
 0xad8   :  { %v1390_v29 = vadd.f32 %v1343_v27, %v1303_v22  ;;  %v1345_v30 = vpop.f32.mrb[42].mxu0  ;;  %v1386_v31 = vpop.f32.mrb[42].mxu1  ;;  %v1392_v32 = vadd.f32 %v1384_v28, %v1305_v25 }
 0xad9   :  { %2148 = vtanh.f32 %v1389_v26  ;;  %v1346_v38 = vpop.f32.mrb[43].mxu0  ;;  %v1387_v2 = vpop.f32.mrb[43].mxu1  ;;  %v1412_v26 = vld [vmem:[#allocation2 + $0x178] sm:$0xff] }
 0xada   :  { %2150 = vtanh.f32 %v1390_v29 }
 0xadb   :  { %2152 = vtanh.f32 %v1392_v32 }
 0xadc   :  { %2154 = vtanh.f32 %v1391_v5  ;;  %v1411_v5 = vld [vmem:[#allocation2 + $0x170] sm:$0xff] }
 0xae3   :  { %v2149_v6 = vpop.eup %2148 }
 0xae4   :  { %v1397_v7 = vmul.f32 0.5, %v2149_v6  ;;  %v2151_v8 = vpop.eup %2150 }
 0xae5   :  { %v1398_v10 = vmul.f32 0.5, %v2151_v8  ;;  %v2153_v12 = vpop.eup %2152 }
 0xae6   :  { %v1400_v9 = vadd.f32 0.5, %v1397_v7  ;;  %v2155_v11 = vpop.eup %2154 }
 0xae7   :  { %v1401_v14 = vadd.f32 0.5, %v1398_v10  ;;  %v1399_v20 = vmul.f32 0.5, %v2155_v11 }
 0xae8   :  { %v1404_v39 = vmul.f32 %v2153_v12, %v1400_v9 }
 0xae9   :  { %v1403_v18 = vmul.f32 %v1401_v14, %v2913_v1  ;;  %v1402_v13 = vadd.f32 0.5, %v1399_v20  ;;  %v1409_v1 = vld [vmem:[#allocation2 + $0x160] sm:$0xff] }
 0xaeb   :  { %v2951_v19 = vadd.f32 %v1404_v39, %v1403_v18 }
 0xaed   :  { %2156 = vtanh.f32 %v2951_v19 }
 0xaf7   :  { %v2157_v21 = vpop.eup %2156 }
 0xaf8   :  { %v1407_v33 = vmul.f32 %v2157_v21, %v1402_v13 }
 0xafa   :  { %v1413_v22 = vpack.c.bf16 %v1407_v33, %v1407_v33 }
 0xafc   :  { %1447 = vmatmul.mubr.bf16.vlgmr.msra.gmra.mrb[44].mxu0 %v1413_v22  ;;  %1488 = vmatmul.mubr.bf16.vlgmr.msra.gmra.mrb[44].mxu1 %v1413_v22 }
 0xafd   :  { %1522 = vmatpush1.bf16.msra.mxu0 %v2700_v56  ;;  %1563 = vmatpush1.bf16.msra.mxu1 %v2703_v57 }
 0xafe   :  { %1523 = vmatprep.subr.bf16.mxu0 %v2706_v59  ;;  %1564 = vmatprep.subr.bf16.mxu1 %v2709_v61 }
 0xaff   :  { %1553 = vmatprep.mubr.bf16.mxu0 %v2330_v0  ;;  %1594 = vmatprep.mubr.bf16.mxu1 %v2330_v0 }
 0xb01   :  { %1524 = vmatpush1.bf16.msra.mxu0 %v2714_v63  ;;  %1565 = vmatpush1.bf16.msra.mxu1 %v2717_v34 }
 0xb02   :  { %1525 = vmatprep.subr.bf16.mxu0 %v2720_v35  ;;  %1566 = vmatprep.subr.bf16.mxu1 %v2723_v58 }
 0xb05   :  { %1526 = vmatpush1.bf16.msra.mxu0 %v2726_v36  ;;  %1567 = vmatpush1.bf16.msra.mxu1 %v2729_v60 }
 0xb06   :  { %1527 = vmatprep.subr.bf16.mxu0 %v2732_v37  ;;  %1568 = vmatprep.subr.bf16.mxu1 %v2735_v62 }
 0xb09   :  { %1528 = vmatpush1.bf16.msra.mxu0 %v2780_v40  ;;  %1569 = vmatpush1.bf16.msra.mxu1 %v2783_v3 }
 0xb0a   :  { %1529 = vmatprep.subr.bf16.mxu0 %v2786_v41  ;;  %1570 = vmatprep.subr.bf16.mxu1 %v2789_v42 }
 0xb0d   :  { %1530 = vmatpush1.bf16.msra.mxu0 %v2792_v43  ;;  %1571 = vmatpush1.bf16.msra.mxu1 %v2795_v44 }
 0xb0e   :  { %1531 = vmatprep.subr.bf16.mxu0 %v2798_v45  ;;  %1572 = vmatprep.subr.bf16.mxu1 %v2801_v46 }
 0xb11   :  { %1532 = vmatpush1.bf16.msra.mxu0 %v2804_v47  ;;  %1573 = vmatpush1.bf16.msra.mxu1 %v2807_v48 }
 0xb12   :  { %1533 = vmatprep.subr.bf16.mxu0 %v2810_v49  ;;  %1574 = vmatprep.subr.bf16.mxu1 %v2813_v50 }
 0xb15   :  { %1534 = vmatpush1.bf16.msra.mxu0 %v2816_v51  ;;  %1575 = vmatpush1.bf16.msra.mxu1 %v2819_v52 }
 0xb16   :  { %1535 = vmatprep.subr.bf16.mxu0 %v2822_v53  ;;  %1576 = vmatprep.subr.bf16.mxu1 %v2825_v54 }
 0xb19   :  { %1536 = vmatpush1.bf16.msra.mxu0 %v2828_v55  ;;  %1577 = vmatpush1.bf16.msra.mxu1 %v2831_v17 }
 0xb1a   :  { %1628 = vmatprep.subr.bf16.mxu0 %v2756_v15  ;;  %1669 = vmatprep.subr.bf16.mxu1 %v2759_v16 }
 0xbcf   :  { %v1448_v24 = vpop.f32.mrb[44].mxu0  ;;  %v1489_v25 = vpop.f32.mrb[44].mxu1 }
 0xbd0   :  { %v1496_v27 = vadd.f32 %v1448_v24, %v1409_v1  ;;  %v1450_v28 = vpop.f32.mrb[45].mxu0  ;;  %v1491_v29 = vpop.f32.mrb[45].mxu1  ;;  %v1498_v6 = vadd.f32 %v1489_v25, %v1411_v5  ;;  %v1517_v24 = vld [vmem:[#allocation2 + $0x188] sm:$0xff] }
 0xbd1   :  { %v1497_v30 = vadd.f32 %v1450_v28, %v1410_v23  ;;  %v1452_v31 = vpop.f32.mrb[46].mxu0  ;;  %v1493_v32 = vpop.f32.mrb[46].mxu1  ;;  %v1499_v38 = vadd.f32 %v1491_v29, %v1412_v26 }
 0xbd2   :  { %2158 = vtanh.f32 %v1496_v27  ;;  %v1453_v2 = vpop.f32.mrb[47].mxu0  ;;  %v1494_v4 = vpop.f32.mrb[47].mxu1  ;;  %v1519_v27 = vld [vmem:[#allocation2 + $0x198] sm:$0xff] }
 0xbd3   :  { %2160 = vtanh.f32 %v1497_v30 }
 0xbd4   :  { %2162 = vtanh.f32 %v1499_v38 }
 0xbd5   :  { %2164 = vtanh.f32 %v1498_v6  ;;  %v1518_v6 = vld [vmem:[#allocation2 + $0x190] sm:$0xff] }
 0xbdc   :  { %v2159_v7 = vpop.eup %2158 }
 0xbdd   :  { %v1504_v8 = vmul.f32 0.5, %v2159_v7  ;;  %v2161_v9 = vpop.eup %2160 }
 0xbde   :  { %v1505_v12 = vmul.f32 0.5, %v2161_v9  ;;  %v2163_v14 = vpop.eup %2162 }
 0xbdf   :  { %v1507_v10 = vadd.f32 0.5, %v1504_v8  ;;  %v2165_v13 = vpop.eup %2164 }
 0xbe0   :  { %v1508_v39 = vadd.f32 0.5, %v1505_v12  ;;  %v1506_v21 = vmul.f32 0.5, %v2165_v13 }
 0xbe1   :  { %v1511_v18 = vmul.f32 %v2163_v14, %v1507_v10 }
 0xbe2   :  { %v1510_v11 = vmul.f32 %v1508_v39, %v2951_v19  ;;  %v1509_v33 = vadd.f32 0.5, %v1506_v21  ;;  %v1516_v19 = vld [vmem:[#allocation2 + $0x180] sm:$0xff] }
 0xbe4   :  { %v2989_v20 = vadd.f32 %v1511_v18, %v1510_v11 }
 0xbe6   :  { %2166 = vtanh.f32 %v2989_v20 }
 0xbf0   :  { %v2167_v22 = vpop.eup %2166 }
 0xbf1   :  { %v1514_v1 = vmul.f32 %v2167_v22, %v1509_v33 }
 0xbf3   :  { %v1520_v23 = vpack.c.bf16 %v1514_v1, %v1514_v1 }
 0xbf5   :  { %1554 = vmatmul.mubr.bf16.vlgmr.msra.gmra.mrb[48].mxu0 %v1520_v23  ;;  %1595 = vmatmul.mubr.bf16.vlgmr.msra.gmra.mrb[48].mxu1 %v1520_v23 }
 0xbf6   :  { %1629 = vmatpush1.bf16.msra.mxu0 %v2700_v56  ;;  %1670 = vmatpush1.bf16.msra.mxu1 %v2703_v57 }
 0xbf7   :  { %1630 = vmatprep.subr.bf16.mxu0 %v2706_v59  ;;  %1671 = vmatprep.subr.bf16.mxu1 %v2709_v61 }
 0xbf8   :  { %1660 = vmatprep.mubr.bf16.mxu0 %v2330_v0  ;;  %1701 = vmatprep.mubr.bf16.mxu1 %v2330_v0 }
 0xbfa   :  { %1631 = vmatpush1.bf16.msra.mxu0 %v2714_v63  ;;  %1672 = vmatpush1.bf16.msra.mxu1 %v2717_v34 }
 0xbfb   :  { %1632 = vmatprep.subr.bf16.mxu0 %v2720_v35  ;;  %1673 = vmatprep.subr.bf16.mxu1 %v2723_v58 }
 0xbfe   :  { %1633 = vmatpush1.bf16.msra.mxu0 %v2726_v36  ;;  %1674 = vmatpush1.bf16.msra.mxu1 %v2729_v60 }
 0xbff   :  { %1634 = vmatprep.subr.bf16.mxu0 %v2732_v37  ;;  %1675 = vmatprep.subr.bf16.mxu1 %v2735_v62 }
 0xc02   :  { %1635 = vmatpush1.bf16.msra.mxu0 %v2780_v40  ;;  %1676 = vmatpush1.bf16.msra.mxu1 %v2783_v3 }
 0xc03   :  { %1636 = vmatprep.subr.bf16.mxu0 %v2786_v41  ;;  %1677 = vmatprep.subr.bf16.mxu1 %v2789_v42 }
 0xc06   :  { %1637 = vmatpush1.bf16.msra.mxu0 %v2792_v43  ;;  %1678 = vmatpush1.bf16.msra.mxu1 %v2795_v44 }
 0xc07   :  { %1638 = vmatprep.subr.bf16.mxu0 %v2798_v45  ;;  %1679 = vmatprep.subr.bf16.mxu1 %v2801_v46 }
 0xc0a   :  { %1639 = vmatpush1.bf16.msra.mxu0 %v2804_v47  ;;  %1680 = vmatpush1.bf16.msra.mxu1 %v2807_v48 }
 0xc0b   :  { %1640 = vmatprep.subr.bf16.mxu0 %v2810_v49  ;;  %1681 = vmatprep.subr.bf16.mxu1 %v2813_v50 }
 0xc0e   :  { %1641 = vmatpush1.bf16.msra.mxu0 %v2816_v51  ;;  %1682 = vmatpush1.bf16.msra.mxu1 %v2819_v52 }
 0xc0f   :  { %1642 = vmatprep.subr.bf16.mxu0 %v2822_v53  ;;  %1683 = vmatprep.subr.bf16.mxu1 %v2825_v54 }
 0xc12   :  { %1643 = vmatpush1.bf16.msra.mxu0 %v2828_v55  ;;  %1684 = vmatpush1.bf16.msra.mxu1 %v2831_v17 }
 0xc13   :  { %1735 = vmatprep.subr.bf16.mxu0 %v2756_v15  ;;  %1776 = vmatprep.subr.bf16.mxu1 %v2759_v16 }
 0xcc8   :  { %v1555_v25 = vpop.f32.mrb[48].mxu0  ;;  %v1596_v26 = vpop.f32.mrb[48].mxu1 }
 0xcc9   :  { %v1603_v28 = vadd.f32 %v1555_v25, %v1516_v19  ;;  %v1557_v29 = vpop.f32.mrb[49].mxu0  ;;  %v1598_v30 = vpop.f32.mrb[49].mxu1  ;;  %v1605_v7 = vadd.f32 %v1596_v26, %v1518_v6 }
 0xcca   :  { %v1604_v31 = vadd.f32 %v1557_v29, %v1517_v24  ;;  %v1559_v32 = vpop.f32.mrb[50].mxu0  ;;  %v1600_v38 = vpop.f32.mrb[50].mxu1  ;;  %v1606_v2 = vadd.f32 %v1598_v30, %v1519_v27 }
 0xccb   :  { %2168 = vtanh.f32 %v1603_v28  ;;  %v1560_v4 = vpop.f32.mrb[51].mxu0  ;;  %v1601_v5 = vpop.f32.mrb[51].mxu1 }
 0xccc   :  { %2170 = vtanh.f32 %v1604_v31 }
 0xccd   :  { %2172 = vtanh.f32 %v1606_v2 }
 0xcce   :  { %2174 = vtanh.f32 %v1605_v7 }
 0xcd5   :  { %v2169_v8 = vpop.eup %2168 }
 0xcd6   :  { %v1611_v9 = vmul.f32 0.5, %v2169_v8  ;;  %v2171_v10 = vpop.eup %2170 }
 0xcd7   :  { %v1612_v14 = vmul.f32 0.5, %v2171_v10  ;;  %v2173_v39 = vpop.eup %2172 }
 0xcd8   :  { %v1614_v12 = vadd.f32 0.5, %v1611_v9  ;;  %v2175_v33 = vpop.eup %2174 }
 0xcd9   :  { %v1615_v18 = vadd.f32 0.5, %v1612_v14  ;;  %v1613_v22 = vmul.f32 0.5, %v2175_v33  ;;  %v2241_v14 = vld [vmem:[#allocation5 + $0x8] ss:$16 sps:$4 sm:$0xff]   ;;  %v2247_v33 = vld [vmem:[#allocation5 + $0x4c] ss:$16 sps:$4 sm:$0xff]  }
 0xcda   :  { %v1618_v11 = vmul.f32 %v2173_v39, %v1614_v12  ;;  %v2240_v12 = vld [vmem:[#allocation5] ss:$16 sps:$4 sm:$0xff]   ;;  %v2242_v39 = vld [vmem:[#allocation5 + $0x24] ss:$16 sps:$4 sm:$0xff]  }
 0xcdb   :  { %v1617_v13 = vmul.f32 %v1615_v18, %v2989_v20  ;;  %v1616_v1 = vadd.f32 0.5, %v1613_v22  ;;  %v2243_v18 = vld [vmem:[#allocation5 + $0x2c] ss:$16 sps:$4 sm:$0xff]   ;;  %v2248_v22 = vld [vmem:[#allocation5 + $0x40] ss:$16 sps:$4 sm:$0xff]  }
 0xcdd   :  { %v3027_v21 = vadd.f32 %v1618_v11, %v1617_v13  ;;  %v2244_v11 = vld [vmem:[#allocation5 + $0x20] ss:$16 sps:$4 sm:$0xff]   ;;  %v2245_v13 = vld [vmem:[#allocation5 + $0x28] ss:$16 sps:$4 sm:$0xff]  }
 0xcdf   :  { %2176 = vtanh.f32 %v3027_v21 }
 0xce9   :  { %v2177_v23 = vpop.eup %2176 }
 0xcea   :  { %v1621_v19 = vmul.f32 %v2177_v23, %v1616_v1  ;;  %v2249_v1 = vld [vmem:[#allocation5 + $0x48] ss:$16 sps:$4 sm:$0xff]   ;;  %v2250_v23 = vld [vmem:[#allocation5 + $0x64] ss:$16 sps:$4 sm:$0xff]  }
 0xcec   :  { %v1627_v24 = vpack.c.bf16 %v1621_v19, %v1621_v19  ;;  %v2251_v19 = vld [vmem:[#allocation5 + $0x6c] ss:$16 sps:$4 sm:$0xff]  }
 0xcee   :  { %1661 = vmatmul.mubr.bf16.vlgmr.msra.gmra.mrb[52].mxu0 %v1627_v24  ;;  %1702 = vmatmul.mubr.bf16.vlgmr.msra.gmra.mrb[52].mxu1 %v1627_v24 }
 0xcef   :  { %1736 = vmatpush1.bf16.msra.mxu0 %v2700_v56  ;;  %1777 = vmatpush1.bf16.msra.mxu1 %v2703_v57  ;;  %v1623_v56 = vld [vmem:[#allocation2 + $0x1a0] sm:$0xff]  ;;  %v1624_v57 = vld [vmem:[#allocation2 + $0x1a8] sm:$0xff] }
 0xcf0   :  { %1737 = vmatprep.subr.bf16.mxu0 %v2706_v59  ;;  %1778 = vmatprep.subr.bf16.mxu1 %v2709_v61 }
 0xcf1   :  { %1767 = vmatprep.mubr.bf16.mxu0 %v2330_v0  ;;  %1808 = vmatprep.mubr.bf16.mxu1 %v2330_v0 }
 0xcf3   :  { %1738 = vmatpush1.bf16.msra.mxu0 %v2714_v63  ;;  %1779 = vmatpush1.bf16.msra.mxu1 %v2717_v34  ;;  %v1626_v63 = vld [vmem:[#allocation2 + $0x1b8] sm:$0xff] }
 0xcf4   :  { %1739 = vmatprep.subr.bf16.mxu0 %v2720_v35  ;;  %1780 = vmatprep.subr.bf16.mxu1 %v2723_v58 }
 0xcf7   :  { %1740 = vmatpush1.bf16.msra.mxu0 %v2726_v36  ;;  %1781 = vmatpush1.bf16.msra.mxu1 %v2729_v60 }
 0xcf8   :  { %1741 = vmatprep.subr.bf16.mxu0 %v2732_v37  ;;  %1782 = vmatprep.subr.bf16.mxu1 %v2735_v62 }
 0xcfb   :  { %1742 = vmatpush1.bf16.msra.mxu0 %v2780_v40  ;;  %1783 = vmatpush1.bf16.msra.mxu1 %v2783_v3 }
 0xcfc   :  { %1743 = vmatprep.subr.bf16.mxu0 %v2786_v41  ;;  %1784 = vmatprep.subr.bf16.mxu1 %v2789_v42 }
 0xcff   :  { %1744 = vmatpush1.bf16.msra.mxu0 %v2792_v43  ;;  %1785 = vmatpush1.bf16.msra.mxu1 %v2795_v44 }
 0xd00   :  { %1745 = vmatprep.subr.bf16.mxu0 %v2798_v45  ;;  %1786 = vmatprep.subr.bf16.mxu1 %v2801_v46 }
 0xd03   :  { %1746 = vmatpush1.bf16.msra.mxu0 %v2804_v47  ;;  %1787 = vmatpush1.bf16.msra.mxu1 %v2807_v48 }
 0xd04   :  { %1747 = vmatprep.subr.bf16.mxu0 %v2810_v49  ;;  %1788 = vmatprep.subr.bf16.mxu1 %v2813_v50 }
 0xd07   :  { %1748 = vmatpush1.bf16.msra.mxu0 %v2816_v51  ;;  %1789 = vmatpush1.bf16.msra.mxu1 %v2819_v52 }
 0xd08   :  { %1749 = vmatprep.subr.bf16.mxu0 %v2822_v53  ;;  %1790 = vmatprep.subr.bf16.mxu1 %v2825_v54 }
 0xd0b   :  { %1750 = vmatpush1.bf16.msra.mxu0 %v2828_v55  ;;  %1791 = vmatpush1.bf16.msra.mxu1 %v2831_v17 }
 0xd0c   :  { %1842 = vmatprep.subr.bf16.mxu0 %v2756_v15  ;;  %1883 = vmatprep.subr.bf16.mxu1 %v2759_v16  ;;  %v1625_v15 = vld [vmem:[#allocation2 + $0x1b0] sm:$0xff] }
 0xdc1   :  { %v1662_v59 = vpop.f32.mrb[52].mxu0  ;;  %v1703_v61 = vpop.f32.mrb[52].mxu1 }
 0xdc2   :  { %v1710_v34 = vadd.f32 %v1662_v59, %v1623_v56  ;;  %v1664_v35 = vpop.f32.mrb[53].mxu0  ;;  %v1705_v58 = vpop.f32.mrb[53].mxu1  ;;  %v1712_v26 = vadd.f32 %v1703_v61, %v1625_v15 }
 0xdc3   :  { %v1711_v36 = vadd.f32 %v1664_v35, %v1624_v57  ;;  %v1666_v60 = vpop.f32.mrb[54].mxu0  ;;  %v1707_v37 = vpop.f32.mrb[54].mxu1  ;;  %v1713_v62 = vadd.f32 %v1705_v58, %v1626_v63 }
 0xdc4   :  { %2178 = vtanh.f32 %v1710_v34  ;;  %v1667_v20 = vpop.f32.mrb[55].mxu0  ;;  %v1708_v25 = vpop.f32.mrb[55].mxu1 }
 0xdc5   :  { %2180 = vtanh.f32 %v1711_v36  ;;  %v1837_v20 = vld [vmem:[#allocation2 + $0x1e0] sm:$0xff]  ;;  %v1838_v25 = vld [vmem:[#allocation2 + $0x1e8] sm:$0xff] }
 0xdc6   :  { %2182 = vtanh.f32 %v1713_v62 }
 0xdc7   :  { %2184 = vtanh.f32 %v1712_v26 }
 0xdce   :  { %v2179_v16 = vpop.eup %2178 }
 0xdcf   :  { %v1718_v27 = vmul.f32 0.5, %v2179_v16  ;;  %v2181_v28 = vpop.eup %2180  ;;  %v1840_v16 = vld [vmem:[#allocation2 + $0x1f8] sm:$0xff] }
 0xdd0   :  { %v1719_v30 = vmul.f32 0.5, %v2181_v28  ;;  %v2183_v31 = vpop.eup %2182 }
 0xdd1   :  { %v1721_v29 = vadd.f32 0.5, %v1718_v27  ;;  %v2185_v5 = vpop.eup %2184 }
 0xdd2   :  { %v1722_v32 = vadd.f32 0.5, %v1719_v30  ;;  %v1720_v6 = vmul.f32 0.5, %v2185_v5  ;;  %v1839_v5 = vld [vmem:[#allocation2 + $0x1f0] sm:$0xff] }
 0xdd3   :  { %v1725_v38 = vmul.f32 %v2183_v31, %v1721_v29 }
 0xdd4   :  { %v1724_v2 = vmul.f32 %v1722_v32, %v3027_v21  ;;  %v1723_v7 = vadd.f32 0.5, %v1720_v6  ;;  %v2246_v21 = vld [vmem:[#allocation5 + $0x44] ss:$16 sps:$4 sm:$0xff]  }
 0xdd6   :  { %v3065_v4 = vadd.f32 %v1725_v38, %v1724_v2 }
 0xdd8   :  { %2186 = vtanh.f32 %v3065_v4 }
 0xde2   :  { %v2187_v8 = vpop.eup %2186 }
 0xde3   :  { %v1728_v9 = vmul.f32 %v2187_v8, %v1723_v7 }
 0xde5   :  { %v1734_v10 = vpack.c.bf16 %v1728_v9, %v1728_v9 }
 0xde7   :  { %1768 = vmatmul.mubr.bf16.vlgmr.msra.gmra.mrb[56].mxu0 %v1734_v10  ;;  %1809 = vmatmul.mubr.bf16.vlgmr.msra.gmra.mrb[56].mxu1 %v1734_v10 }
 0xde8   :  { %1843 = vmatpush1.bf16.msra.mxu0 %v2240_v12  ;;  %1884 = vmatpush1.bf16.msra.mxu1 %v2241_v14 }
 0xde9   :  { %1844 = vmatprep.subr.bf16.mxu0 %v2242_v39  ;;  %1885 = vmatprep.subr.bf16.mxu1 %v2243_v18 }
 0xdea   :  { %1874 = vmatprep.mubr.bf16.mxu0 %v2330_v0  ;;  %1915 = vmatprep.mubr.bf16.mxu1 %v2330_v0  ;;  %v1730_v0 = vld [vmem:[#allocation2 + $0x1c0] sm:$0xff] }
 0xdec   :  { %1845 = vmatpush1.bf16.msra.mxu0 %v2244_v11  ;;  %1886 = vmatpush1.bf16.msra.mxu1 %v2245_v13 }
 0xded   :  { %1846 = vmatprep.subr.bf16.mxu0 %v2246_v21  ;;  %1887 = vmatprep.subr.bf16.mxu1 %v2247_v33 }
 0xdf0   :  { %1847 = vmatpush1.bf16.msra.mxu0 %v2248_v22  ;;  %1888 = vmatpush1.bf16.msra.mxu1 %v2249_v1 }
 0xdf1   :  { %1848 = vmatprep.subr.bf16.mxu0 %v2250_v23  ;;  %1889 = vmatprep.subr.bf16.mxu1 %v2251_v19 }
 0xdf4   :  { %1849 = vmatpush1.bf16.msra.mxu0 %v2780_v40  ;;  %1890 = vmatpush1.bf16.msra.mxu1 %v2783_v3  ;;  %v1731_v40 = vld [vmem:[#allocation2 + $0x1c8] sm:$0xff] }
 0xdf5   :  { %1850 = vmatprep.subr.bf16.mxu0 %v2786_v41  ;;  %1891 = vmatprep.subr.bf16.mxu1 %v2789_v42  ;;  %v1733_v42 = vld [vmem:[#allocation2 + $0x1d8] sm:$0xff] }
 0xdf8   :  { %1851 = vmatpush1.bf16.msra.mxu0 %v2792_v43  ;;  %1892 = vmatpush1.bf16.msra.mxu1 %v2795_v44 }
 0xdf9   :  { %1852 = vmatprep.subr.bf16.mxu0 %v2798_v45  ;;  %1893 = vmatprep.subr.bf16.mxu1 %v2801_v46 }
 0xdfc   :  { %1853 = vmatpush1.bf16.msra.mxu0 %v2804_v47  ;;  %1894 = vmatpush1.bf16.msra.mxu1 %v2807_v48 }
 0xdfd   :  { %1854 = vmatprep.subr.bf16.mxu0 %v2810_v49  ;;  %1895 = vmatprep.subr.bf16.mxu1 %v2813_v50 }
 0xe00   :  { %1855 = vmatpush1.bf16.msra.mxu0 %v2816_v51  ;;  %1896 = vmatpush1.bf16.msra.mxu1 %v2819_v52  ;;  %v1732_v52 = vld [vmem:[#allocation2 + $0x1d0] sm:$0xff] }
 0xe01   :  { %1856 = vmatprep.subr.bf16.mxu0 %v2822_v53  ;;  %1897 = vmatprep.subr.bf16.mxu1 %v2825_v54 }
 0xe04   :  { %1857 = vmatpush1.bf16.msra.mxu0 %v2828_v55  ;;  %1898 = vmatpush1.bf16.msra.mxu1 %v2831_v17 }
 0xeba   :  { %v1769_v3 = vpop.f32.mrb[56].mxu0  ;;  %v1810_v41 = vpop.f32.mrb[56].mxu1 }
 0xebb   :  { %v1817_v43 = vadd.f32 %v1769_v3, %v1730_v0  ;;  %v1771_v44 = vpop.f32.mrb[57].mxu0  ;;  %v1812_v45 = vpop.f32.mrb[57].mxu1  ;;  %v1819_v53 = vadd.f32 %v1810_v41, %v1732_v52 }
 0xebc   :  { %v1818_v46 = vadd.f32 %v1771_v44, %v1731_v40  ;;  %v1773_v47 = vpop.f32.mrb[58].mxu0  ;;  %v1814_v48 = vpop.f32.mrb[58].mxu1  ;;  %v1820_v49 = vadd.f32 %v1812_v45, %v1733_v42 }
 0xebd   :  { %2188 = vtanh.f32 %v1817_v43  ;;  %v1774_v50 = vpop.f32.mrb[59].mxu0  ;;  %v1815_v51 = vpop.f32.mrb[59].mxu1 }
 0xebe   :  { %2190 = vtanh.f32 %v1818_v46 }
 0xebf   :  { %2192 = vtanh.f32 %v1820_v49 }
 0xec0   :  { %2194 = vtanh.f32 %v1819_v53 }
 0xec7   :  { %v2189_v54 = vpop.eup %2188 }
 0xec8   :  { %v1825_v55 = vmul.f32 0.5, %v2189_v54  ;;  %v2191_v17 = vpop.eup %2190 }
 0xec9   :  { %v1826_v56 = vmul.f32 0.5, %v2191_v17  ;;  %v2193_v57 = vpop.eup %2192 }
 0xeca   :  { %v1828_v24 = vadd.f32 0.5, %v1825_v55  ;;  %v2195_v35 = vpop.eup %2194 }
 0xecb   :  { %v1829_v59 = vadd.f32 0.5, %v1826_v56  ;;  %v1827_v58 = vmul.f32 0.5, %v2195_v35 }
 0xecc   :  { %v1832_v61 = vmul.f32 %v2193_v57, %v1828_v24 }
 0xecd   :  { %v1831_v63 = vmul.f32 %v1829_v59, %v3065_v4  ;;  %v1830_v36 = vadd.f32 0.5, %v1827_v58 }
 0xecf   :  { %v1833_v34 = vadd.f32 %v1832_v61, %v1831_v63 }
 0xed1   :  { %2196 = vtanh.f32 %v1833_v34 }
 0xedb   :  { %v2197_v60 = vpop.eup %2196 }
 0xedc   :  { %v1835_v37 = vmul.f32 %v2197_v60, %v1830_v36 }
 0xede   :  { %v1841_v62 = vpack.c.bf16 %v1835_v37, %v1835_v37 }
 0xee0   :  { %1875 = vmatmul.mubr.bf16.vlgmr.msra.gmra.mrb[60].mxu0 %v1841_v62  ;;  %1916 = vmatmul.mubr.bf16.vlgmr.msra.gmra.mrb[60].mxu1 %v1841_v62 }
 0xfb3   :  { %v1876_v15 = vpop.f32.mrb[60].mxu0  ;;  %v1917_v26 = vpop.f32.mrb[60].mxu1 }
 0xfb4   :  { %v1924_v27 = vadd.f32 %v1876_v15, %v1837_v20  ;;  %v1878_v28 = vpop.f32.mrb[61].mxu0  ;;  %v1919_v29 = vpop.f32.mrb[61].mxu1  ;;  %v1926_v6 = vadd.f32 %v1917_v26, %v1839_v5 }
 0xfb5   :  { %v1925_v30 = vadd.f32 %v1878_v28, %v1838_v25  ;;  %v1880_v31 = vpop.f32.mrb[62].mxu0  ;;  %v1921_v32 = vpop.f32.mrb[62].mxu1  ;;  %v1927_v38 = vadd.f32 %v1919_v29, %v1840_v16 }
 0xfb6   :  { %2198 = vtanh.f32 %v1924_v27  ;;  %v1881_v2 = vpop.f32.mrb[63].mxu0  ;;  %v1922_v4 = vpop.f32.mrb[63].mxu1 }
 0xfb7   :  { %2200 = vtanh.f32 %v1925_v30 }
 0xfb8   :  { %2202 = vtanh.f32 %v1927_v38 }
 0xfb9   :  { %2204 = vtanh.f32 %v1926_v6 }
 0xfc0   :  { %v2199_v7 = vpop.eup %2198 }
 0xfc1   :  { %v1932_v8 = vmul.f32 0.5, %v2199_v7  ;;  %v2201_v9 = vpop.eup %2200 }
 0xfc2   :  { %v1933_v12 = vmul.f32 0.5, %v2201_v9  ;;  %v2203_v14 = vpop.eup %2202 }
 0xfc3   :  { %v1935_v10 = vadd.f32 0.5, %v1932_v8  ;;  %v2205_v21 = vpop.eup %2204 }
 0xfc4   :  { %v1936_v39 = vadd.f32 0.5, %v1933_v12  ;;  %v1934_v33 = vmul.f32 0.5, %v2205_v21 }
 0xfc5   :  { %v1939_v18 = vmul.f32 %v2203_v14, %v1935_v10 }
 0xfc6   :  { %v1938_v11 = vmul.f32 %v1936_v39, %v1833_v34  ;;  %v1937_v22 = vadd.f32 0.5, %v1934_v33 }
 0xfc8   :  { %v1940_v13 = vadd.f32 %v1939_v18, %v1938_v11 }
 0xfca   :  { %2206 = vtanh.f32 %v1940_v13 }
 0xfd4   :  { %v2207_v1 = vpop.eup %2206 }
 0xfd5   :  { %v1942_v23 = vmul.f32 %v2207_v1, %v1937_v22 }
 0xfd7   :  { %1943 = vst [vmem:[#allocation7] sm:$0xff] %v1942_v23 }
 0xfd8   :  { %2307 = shalt.err (!%p2304_p6)
}
 0xfd9   :  { %s2308_s12 = scalar_lea.hbm %s3103_s2, 128 }
 0xfda   :  { %p2309_p7 = scmp.ne.s32.totalorder %s3103_s2, %s2308_s12  ;;  %p2312_p8 = scmp.lt.u32.totalorder %s2308_s12, %s3103_s2 }
 0xfdc   :  { %p2314_p9 = pnand %p2312_p8, %p2309_p7 }
 0xfde   :  { %2317 = shalt.err (!%p2314_p9)
}
 0xfdf   :  { %1953 = dma.vmem_to_hbm [thread:$0]  %s1951_s8, 128, %s3103_s2, [#allocation4]  }
 0xfe0   :  { %2322 = dma.done.wait [#allocation4], 128  }
 0xfe1   :  { %2323 = vsyncadd [#allocation4], 4294967168 }
 0xfe2   :  { %1957 = vsyncpa [#allocation3], 1 }
 0xfe3   :  { %1958 = vsyncpa [#allocation6], 1 }
 0xfe4   :  { %1959 = vsyncpa [#allocation4], 1 }

</bundles_post_ra>
